<compile_context>
chip_gen: v5e
topology: v5e:2x2
jax: 0.10.0
libtpu: 0.0.40
codegen_flags: <defaults>
</compile_context>

<pallas_src>
import functools

import jax
import jax.numpy as jnp
from jax.experimental import pallas as pl
from jax.experimental.pallas import tpu as pltpu

HIDDEN = 32        # hidden_dim (small-shape stand-in for the module's 51; 4*H = 128 lanes)
INPUT_SIZE = 1
N_LAYERS = 2
OUTPUT_SIZE = 1
B_PAD = 8          # fp32 sublane minimum


def _lstm_kernel(T, H,
                 x_ref, h0_ref, c0_ref,
                 wih0_ref, whh0_ref, wih1_ref, whh1_ref,
                 b0_ref, b1_ref, wfc_ref, bfc_ref,
                 out_ref, hN_ref, cN_ref):
    """Wavefront 2-layer LSTM.  All weights are (in, 4H) row-major, gates packed i|f|g|o."""
    f32 = jnp.float32

    def gate_math(gates, c_prev):
        # gates: (BP, 4H) packed.  Two EUP ops over the packed tile, then static
        # lane slices (XLU) pick each 32-lane gate block.  PyTorch order i,f,g,o.
        sg = jax.nn.sigmoid(gates)
        tg = jnp.tanh(gates)
        i = sg[:, 0 * H:1 * H]
        f = sg[:, 1 * H:2 * H]
        g = tg[:, 2 * H:3 * H]
        o = sg[:, 3 * H:4 * H]
        c_new = f * c_prev + i * g
        h_new = o * jnp.tanh(c_new)
        return h_new, c_new

    def l0_step(t_idx, h, c):
        # INPUT_SIZE == 1 -> input projection is a broadcast multiply-add (VPU).
        xt = x_ref[t_idx]                                              # (BP, 1)
        gates = (xt * wih0_ref[...] + b0_ref[...]
                 + jnp.dot(h, whh0_ref[...], preferred_element_type=f32))
        h_new, c_new = gate_math(gates, c)
        # Issue layer-1's input projection for this step immediately (wavefront).
        xp1 = jnp.dot(h_new, wih1_ref[...], preferred_element_type=f32) + b1_ref[...]
        return h_new, c_new, xp1

    def l1_step(xp1, h, c):
        gates = xp1 + jnp.dot(h, whh1_ref[...], preferred_element_type=f32)
        return gate_math(gates, c)

    h0, c0 = h0_ref[0], c0_ref[0]          # (BP, H) each, live in vregs
    h1, c1 = h0_ref[1], c0_ref[1]

    # Prime the wavefront with layer-0 step 0.
    h0, c0, xp1 = l0_step(0, h0, c0)
    for t in range(1, T):                  # static unroll (T is small)
        # Layer-0 step t and layer-1 step t-1 are mutually independent; emitted
        # back-to-back so the scheduler overlaps their MXU/EUP/VPU work.
        h0, c0, xp1_next = l0_step(t, h0, c0)
        h1, c1 = l1_step(xp1, h1, c1)
        xp1 = xp1_next
    h1, c1 = l1_step(xp1, h1, c1)          # layer-1 final step (t = T-1)

    hN_ref[0] = h0
    cN_ref[0] = c0
    hN_ref[1] = h1
    cN_ref[1] = c1

    # Classification head on the last timestep of the top layer.
    # TODO(synk): the reference does `lstm_out.view(-1, H)` then `[:, -1, :]`
    # (shape-inconsistent) and calls undefined `self.sigmoid`; we implement the
    # intended semantics: sigmoid(fc(last-timestep top-layer output)).
    # OUTPUT_SIZE == 1 -> lane reduction instead of an N=1 MXU matmul.
    logits = jnp.sum(h1 * wfc_ref[...], axis=-1, keepdims=True) + bfc_ref[...]
    out_ref[...] = jax.nn.sigmoid(logits)


def prepare_params(params):
    """One-time parameter prep (hoisted out of the per-call path).

    With H=32 the packed 4*H gate width is exactly 128 lanes, so the PyTorch
    weights only need a transpose (no per-gate padding) and the two biases fuse.
    """
    return dict(
        wih0=jnp.asarray(params['w_ih_l0']).T,                      # (I,  4H)
        whh0=jnp.asarray(params['w_hh_l0']).T,                      # (H,  4H)
        wih1=jnp.asarray(params['w_ih_l1']).T,                      # (H,  4H)
        whh1=jnp.asarray(params['w_hh_l1']).T,                      # (H,  4H)
        b0=(params['b_ih_l0'] + params['b_hh_l0'])[None, :],        # (1,  4H)
        b1=(params['b_ih_l1'] + params['b_hh_l1'])[None, :],        # (1,  4H)
        wfc=jnp.asarray(params['w_fc']),                            # (1,  H)
        bfc=jnp.asarray(params['b_fc'])[None, :],                   # (1,  1)
    )


@functools.partial(jax.jit, static_argnames=())
def lstm_classifier_forward(x, hidden, prepped):
    """x: (B, T, input_size) float32; hidden: (h0, c0) each (n_layers, B, HIDDEN)."""
    h0, c0 = hidden
    B, T, _ = x.shape
    H, BP = HIDDEN, B_PAD

    # Emulate `x = x.long()`: truncate toward zero (then feed as float, since
    # nn.LSTM requires floating point inputs).
    # TODO(synk): passing int64 to nn.LSTM would actually error in PyTorch.
    x_tm = jnp.trunc(x).astype(jnp.float32)
    # Time-major, batch padded to the fp32 sublane tile.  These tiny pads are the
    # only per-call XLA ops outside the kernel; padded rows never mix across
    # sublanes and are sliced off below.
    x_tm = jnp.pad(jnp.transpose(x_tm, (1, 0, 2)), ((0, 0), (0, BP - B), (0, 0)))
    h0p = jnp.pad(h0, ((0, 0), (0, BP - B), (0, 0)))                 # (L, BP, H)
    c0p = jnp.pad(c0, ((0, 0), (0, BP - B), (0, 0)))

    vmem = pl.BlockSpec(memory_space=pltpu.MemorySpace.VMEM)
    out, hN, cN = pl.pallas_call(
        functools.partial(_lstm_kernel, T, H),
        out_shape=(
            jax.ShapeDtypeStruct((BP, OUTPUT_SIZE), jnp.float32),
            jax.ShapeDtypeStruct((N_LAYERS, BP, H), jnp.float32),
            jax.ShapeDtypeStruct((N_LAYERS, BP, H), jnp.float32),
        ),
        in_specs=[vmem] * 11,
        out_specs=(vmem, vmem, vmem),
    )(x_tm, h0p, c0p,
      prepped['wih0'], prepped['whh0'], prepped['wih1'], prepped['whh1'],
      prepped['b0'], prepped['b1'], prepped['wfc'], prepped['bfc'])

    # Strip batch padding back to the model's true shapes.
    return out[:B, :], (hN[:, :B, :], cN[:, :B, :])


def _reference_forward(x, hidden, params):
    """Pure-JAX reference (PyTorch nn.LSTM semantics, same reinterpretation)."""
    h0, c0 = hidden
    x = jnp.trunc(x).astype(jnp.float32)
    B, T, _ = x.shape
    H = HIDDEN

    def cell(x_in, h_prev, c_prev, wih, whh, b_ih, b_hh):
        gates = x_in @ wih.T + h_prev @ whh.T + b_ih + b_hh
        i = jax.nn.sigmoid(gates[:, 0 * H:1 * H])
        f = jax.nn.sigmoid(gates[:, 1 * H:2 * H])
        g = jnp.tanh(gates[:, 2 * H:3 * H])
        o = jax.nn.sigmoid(gates[:, 3 * H:4 * H])
        c = f * c_prev + i * g
        h = o * jnp.tanh(c)
        return h, c

    h = [h0[0], h0[1]]
    c = [c0[0], c0[1]]
    for t in range(T):
        xt = x[:, t, :]
        h[0], c[0] = cell(xt, h[0], c[0], params['w_ih_l0'], params['w_hh_l0'],
                          params['b_ih_l0'], params['b_hh_l0'])
        h[1], c[1] = cell(h[0], h[1], c[1], params['w_ih_l1'], params['w_hh_l1'],
                          params['b_ih_l1'], params['b_hh_l1'])
    out = jax.nn.sigmoid(h[1] @ params['w_fc'].T + params['b_fc'])
    return out, (jnp.stack(h), jnp.stack(c))


if __name__ == "__main__":
    B, T = 2, 8
    key = jax.random.PRNGKey(0)
    keys = jax.random.split(key, 11)
    bound = 1.0 / float(jnp.sqrt(HIDDEN))

    def u(k, shape):
        return jax.random.uniform(k, shape, jnp.float32, -bound, bound)

    # Deterministic parameter init (PyTorch-style uniform(-1/sqrt(H), 1/sqrt(H))).
    params = {
        'w_ih_l0': u(keys[0], (4 * HIDDEN, INPUT_SIZE)),
        'w_hh_l0': u(keys[1], (4 * HIDDEN, HIDDEN)),
        'b_ih_l0': u(keys[2], (4 * HIDDEN,)),
        'b_hh_l0': u(keys[3], (4 * HIDDEN,)),
        'w_ih_l1': u(keys[4], (4 * HIDDEN, HIDDEN)),
        'w_hh_l1': u(keys[5], (4 * HIDDEN, HIDDEN)),
        'b_ih_l1': u(keys[6], (4 * HIDDEN,)),
        'b_hh_l1': u(keys[7], (4 * HIDDEN,)),
        'w_fc':    u(keys[8], (OUTPUT_SIZE, HIDDEN)),
        'b_fc':    u(keys[9], (OUTPUT_SIZE,)),
    }
    prepped = prepare_params(params)     # one-time prep, outside the hot path

    x = jax.random.uniform(keys[10], (B, T, INPUT_SIZE), jnp.float32, 0.0, 4.0)
    # TODO(synk): the module's init_hidden returns (1,1,H) long tensors, which is
    # shape/dtype-inconsistent with a 2-layer float LSTM; use the correct
    # (n_layers, B, H) float zeros instead.
    h0 = jnp.zeros((N_LAYERS, B, HIDDEN), jnp.float32)
    c0 = jnp.zeros((N_LAYERS, B, HIDDEN), jnp.float32)

    out, (hN, cN) = lstm_classifier_forward(x, (h0, c0), prepped)
    jax.block_until_ready((out, hN, cN))

    ref_out, (ref_hN, ref_cN) = _reference_forward(x, (h0, c0), params)
    assert out.shape == (B, OUTPUT_SIZE)
    assert hN.shape == (N_LAYERS, B, HIDDEN) and cN.shape == (N_LAYERS, B, HIDDEN)
    assert float(jnp.max(jnp.abs(out - ref_out))) < 1e-3
    assert float(jnp.max(jnp.abs(hN - ref_hN))) < 1e-3
    assert float(jnp.max(jnp.abs(cN - ref_cN))) < 1e-3
    print("KERNEL_OK")
</pallas_src>

<mosaic_0001>
module attributes {stable_mosaic.version = 11 : i64} {
  func.func @_lstm_kernel(%arg0: memref<8x8x1xf32, #tpu.memory_space<vmem>>, %arg1: memref<2x8x32xf32, #tpu.memory_space<vmem>>, %arg2: memref<2x8x32xf32, #tpu.memory_space<vmem>>, %arg3: memref<1x128xf32, #tpu.memory_space<vmem>>, %arg4: memref<32x128xf32, #tpu.memory_space<vmem>>, %arg5: memref<32x128xf32, #tpu.memory_space<vmem>>, %arg6: memref<32x128xf32, #tpu.memory_space<vmem>>, %arg7: memref<1x128xf32, #tpu.memory_space<vmem>>, %arg8: memref<1x128xf32, #tpu.memory_space<vmem>>, %arg9: memref<1x32xf32, #tpu.memory_space<vmem>>, %arg10: memref<1x1xf32, #tpu.memory_space<vmem>>, %arg11: memref<8x1xf32, #tpu.memory_space<vmem>>, %arg12: memref<2x8x32xf32, #tpu.memory_space<vmem>>, %arg13: memref<2x8x32xf32, #tpu.memory_space<vmem>>) attributes {dimension_semantics = [], scalar_prefetch = 0 : i64, scratch_operands = 0 : i64, tpu.core_type = #tpu.core_type<tc>} {
    %c0 = arith.constant 0 : index
    %c0_0 = arith.constant 0 : index
    %c0_1 = arith.constant 0 : index
    %0 = vector.load %arg1[%c0, %c0_0, %c0_1] : memref<2x8x32xf32, #tpu.memory_space<vmem>>, vector<1x8x32xf32>
    %1 = vector.shape_cast %0 : vector<1x8x32xf32> to vector<8x32xf32>
    %c0_2 = arith.constant 0 : index
    %c0_3 = arith.constant 0 : index
    %c0_4 = arith.constant 0 : index
    %2 = vector.load %arg2[%c0_2, %c0_3, %c0_4] : memref<2x8x32xf32, #tpu.memory_space<vmem>>, vector<1x8x32xf32>
    %3 = vector.shape_cast %2 : vector<1x8x32xf32> to vector<8x32xf32>
    %c1 = arith.constant 1 : index
    %c0_5 = arith.constant 0 : index
    %c0_6 = arith.constant 0 : index
    %4 = vector.load %arg1[%c1, %c0_5, %c0_6] : memref<2x8x32xf32, #tpu.memory_space<vmem>>, vector<1x8x32xf32>
    %5 = vector.shape_cast %4 : vector<1x8x32xf32> to vector<8x32xf32>
    %c1_7 = arith.constant 1 : index
    %c0_8 = arith.constant 0 : index
    %c0_9 = arith.constant 0 : index
    %6 = vector.load %arg2[%c1_7, %c0_8, %c0_9] : memref<2x8x32xf32, #tpu.memory_space<vmem>>, vector<1x8x32xf32>
    %7 = vector.shape_cast %6 : vector<1x8x32xf32> to vector<8x32xf32>
    %c0_10 = arith.constant 0 : index
    %c0_11 = arith.constant 0 : index
    %c0_12 = arith.constant 0 : index
    %8 = vector.load %arg0[%c0_10, %c0_11, %c0_12] : memref<8x8x1xf32, #tpu.memory_space<vmem>>, vector<1x8x1xf32>
    %9 = vector.shape_cast %8 : vector<1x8x1xf32> to vector<8x1xf32>
    %c0_13 = arith.constant 0 : index
    %c0_14 = arith.constant 0 : index
    %10 = vector.load %arg3[%c0_13, %c0_14] : memref<1x128xf32, #tpu.memory_space<vmem>>, vector<1x128xf32>
    %11 = vector.broadcast %9 : vector<8x1xf32> to vector<8x128xf32>
    %12 = vector.broadcast %10 : vector<1x128xf32> to vector<8x128xf32>
    %13 = arith.mulf %11, %12 : vector<8x128xf32>
    %c0_15 = arith.constant 0 : index
    %c0_16 = arith.constant 0 : index
    %14 = vector.load %arg7[%c0_15, %c0_16] : memref<1x128xf32, #tpu.memory_space<vmem>>, vector<1x128xf32>
    %15 = vector.broadcast %14 : vector<1x128xf32> to vector<8x128xf32>
    %16 = arith.addf %13, %15 : vector<8x128xf32>
    %c0_17 = arith.constant 0 : index
    %c0_18 = arith.constant 0 : index
    %17 = vector.load %arg4[%c0_17, %c0_18] : memref<32x128xf32, #tpu.memory_space<vmem>>, vector<32x128xf32>
    %cst = arith.constant dense<0.000000e+00> : vector<8x128xf32>
    %18 = tpu.matmul %1, %17, %cst {dimension_numbers = #tpu.dot_dimension_numbers<[1], [0], [0], [1], [0, 0, 1, 1], [], []>} : vector<8x32xf32>, vector<32x128xf32>, vector<8x128xf32> -> vector<8x128xf32>
    %19 = arith.addf %16, %18 : vector<8x128xf32>
    %20 = arith.negf %19 : vector<8x128xf32>
    %21 = math.exp %20 : vector<8x128xf32>
    %cst_19 = arith.constant 1.000000e+00 : f32
    %22 = vector.broadcast %cst_19 : f32 to vector<8x128xf32>
    %23 = arith.addf %22, %21 : vector<8x128xf32>
    %24 = arith.divf %22, %23 : vector<8x128xf32>
    %25 = math.tanh %19 : vector<8x128xf32>
    %26 = vector.extract_strided_slice %24 {offsets = [0, 0], sizes = [8, 32], strides = [1, 1]} : vector<8x128xf32> to vector<8x32xf32>
    %27 = vector.extract_strided_slice %24 {offsets = [0, 32], sizes = [8, 32], strides = [1, 1]} : vector<8x128xf32> to vector<8x32xf32>
    %28 = vector.extract_strided_slice %25 {offsets = [0, 64], sizes = [8, 32], strides = [1, 1]} : vector<8x128xf32> to vector<8x32xf32>
    %29 = vector.extract_strided_slice %24 {offsets = [0, 96], sizes = [8, 32], strides = [1, 1]} : vector<8x128xf32> to vector<8x32xf32>
    %30 = arith.mulf %27, %3 : vector<8x32xf32>
    %31 = arith.mulf %26, %28 : vector<8x32xf32>
    %32 = arith.addf %30, %31 : vector<8x32xf32>
    %33 = math.tanh %32 : vector<8x32xf32>
    %34 = arith.mulf %29, %33 : vector<8x32xf32>
    %c0_20 = arith.constant 0 : index
    %c0_21 = arith.constant 0 : index
    %35 = vector.load %arg5[%c0_20, %c0_21] : memref<32x128xf32, #tpu.memory_space<vmem>>, vector<32x128xf32>
    %cst_22 = arith.constant dense<0.000000e+00> : vector<8x128xf32>
    %36 = tpu.matmul %34, %35, %cst_22 {dimension_numbers = #tpu.dot_dimension_numbers<[1], [0], [0], [1], [0, 0, 1, 1], [], []>} : vector<8x32xf32>, vector<32x128xf32>, vector<8x128xf32> -> vector<8x128xf32>
    %c0_23 = arith.constant 0 : index
    %c0_24 = arith.constant 0 : index
    %37 = vector.load %arg8[%c0_23, %c0_24] : memref<1x128xf32, #tpu.memory_space<vmem>>, vector<1x128xf32>
    %38 = vector.broadcast %37 : vector<1x128xf32> to vector<8x128xf32>
    %39 = arith.addf %36, %38 : vector<8x128xf32>
    %c1_25 = arith.constant 1 : index
    %c0_26 = arith.constant 0 : index
    %c0_27 = arith.constant 0 : index
    %40 = vector.load %arg0[%c1_25, %c0_26, %c0_27] : memref<8x8x1xf32, #tpu.memory_space<vmem>>, vector<1x8x1xf32>
    %41 = vector.shape_cast %40 : vector<1x8x1xf32> to vector<8x1xf32>
    %c0_28 = arith.constant 0 : index
    %c0_29 = arith.constant 0 : index
    %42 = vector.load %arg3[%c0_28, %c0_29] : memref<1x128xf32, #tpu.memory_space<vmem>>, vector<1x128xf32>
    %43 = vector.broadcast %41 : vector<8x1xf32> to vector<8x128xf32>
    %44 = vector.broadcast %42 : vector<1x128xf32> to vector<8x128xf32>
    %45 = arith.mulf %43, %44 : vector<8x128xf32>
    %c0_30 = arith.constant 0 : index
    %c0_31 = arith.constant 0 : index
    %46 = vector.load %arg7[%c0_30, %c0_31] : memref<1x128xf32, #tpu.memory_space<vmem>>, vector<1x128xf32>
    %47 = vector.broadcast %46 : vector<1x128xf32> to vector<8x128xf32>
    %48 = arith.addf %45, %47 : vector<8x128xf32>
    %c0_32 = arith.constant 0 : index
    %c0_33 = arith.constant 0 : index
    %49 = vector.load %arg4[%c0_32, %c0_33] : memref<32x128xf32, #tpu.memory_space<vmem>>, vector<32x128xf32>
    %cst_34 = arith.constant dense<0.000000e+00> : vector<8x128xf32>
    %50 = tpu.matmul %34, %49, %cst_34 {dimension_numbers = #tpu.dot_dimension_numbers<[1], [0], [0], [1], [0, 0, 1, 1], [], []>} : vector<8x32xf32>, vector<32x128xf32>, vector<8x128xf32> -> vector<8x128xf32>
    %51 = arith.addf %48, %50 : vector<8x128xf32>
    %52 = arith.negf %51 : vector<8x128xf32>
    %53 = math.exp %52 : vector<8x128xf32>
    %cst_35 = arith.constant 1.000000e+00 : f32
    %54 = vector.broadcast %cst_35 : f32 to vector<8x128xf32>
    %55 = arith.addf %54, %53 : vector<8x128xf32>
    %56 = arith.divf %54, %55 : vector<8x128xf32>
    %57 = math.tanh %51 : vector<8x128xf32>
    %58 = vector.extract_strided_slice %56 {offsets = [0, 0], sizes = [8, 32], strides = [1, 1]} : vector<8x128xf32> to vector<8x32xf32>
    %59 = vector.extract_strided_slice %56 {offsets = [0, 32], sizes = [8, 32], strides = [1, 1]} : vector<8x128xf32> to vector<8x32xf32>
    %60 = vector.extract_strided_slice %57 {offsets = [0, 64], sizes = [8, 32], strides = [1, 1]} : vector<8x128xf32> to vector<8x32xf32>
    %61 = vector.extract_strided_slice %56 {offsets = [0, 96], sizes = [8, 32], strides = [1, 1]} : vector<8x128xf32> to vector<8x32xf32>
    %62 = arith.mulf %59, %32 : vector<8x32xf32>
    %63 = arith.mulf %58, %60 : vector<8x32xf32>
    %64 = arith.addf %62, %63 : vector<8x32xf32>
    %65 = math.tanh %64 : vector<8x32xf32>
    %66 = arith.mulf %61, %65 : vector<8x32xf32>
    %c0_36 = arith.constant 0 : index
    %c0_37 = arith.constant 0 : index
    %67 = vector.load %arg5[%c0_36, %c0_37] : memref<32x128xf32, #tpu.memory_space<vmem>>, vector<32x128xf32>
    %cst_38 = arith.constant dense<0.000000e+00> : vector<8x128xf32>
    %68 = tpu.matmul %66, %67, %cst_38 {dimension_numbers = #tpu.dot_dimension_numbers<[1], [0], [0], [1], [0, 0, 1, 1], [], []>} : vector<8x32xf32>, vector<32x128xf32>, vector<8x128xf32> -> vector<8x128xf32>
    %c0_39 = arith.constant 0 : index
    %c0_40 = arith.constant 0 : index
    %69 = vector.load %arg8[%c0_39, %c0_40] : memref<1x128xf32, #tpu.memory_space<vmem>>, vector<1x128xf32>
    %70 = vector.broadcast %69 : vector<1x128xf32> to vector<8x128xf32>
    %71 = arith.addf %68, %70 : vector<8x128xf32>
    %c0_41 = arith.constant 0 : index
    %c0_42 = arith.constant 0 : index
    %72 = vector.load %arg6[%c0_41, %c0_42] : memref<32x128xf32, #tpu.memory_space<vmem>>, vector<32x128xf32>
    %cst_43 = arith.constant dense<0.000000e+00> : vector<8x128xf32>
    %73 = tpu.matmul %5, %72, %cst_43 {dimension_numbers = #tpu.dot_dimension_numbers<[1], [0], [0], [1], [0, 0, 1, 1], [], []>} : vector<8x32xf32>, vector<32x128xf32>, vector<8x128xf32> -> vector<8x128xf32>
    %74 = arith.addf %39, %73 : vector<8x128xf32>
    %75 = arith.negf %74 : vector<8x128xf32>
    %76 = math.exp %75 : vector<8x128xf32>
    %cst_44 = arith.constant 1.000000e+00 : f32
    %77 = vector.broadcast %cst_44 : f32 to vector<8x128xf32>
    %78 = arith.addf %77, %76 : vector<8x128xf32>
    %79 = arith.divf %77, %78 : vector<8x128xf32>
    %80 = math.tanh %74 : vector<8x128xf32>
    %81 = vector.extract_strided_slice %79 {offsets = [0, 0], sizes = [8, 32], strides = [1, 1]} : vector<8x128xf32> to vector<8x32xf32>
    %82 = vector.extract_strided_slice %79 {offsets = [0, 32], sizes = [8, 32], strides = [1, 1]} : vector<8x128xf32> to vector<8x32xf32>
    %83 = vector.extract_strided_slice %80 {offsets = [0, 64], sizes = [8, 32], strides = [1, 1]} : vector<8x128xf32> to vector<8x32xf32>
    %84 = vector.extract_strided_slice %79 {offsets = [0, 96], sizes = [8, 32], strides = [1, 1]} : vector<8x128xf32> to vector<8x32xf32>
    %85 = arith.mulf %82, %7 : vector<8x32xf32>
    %86 = arith.mulf %81, %83 : vector<8x32xf32>
    %87 = arith.addf %85, %86 : vector<8x32xf32>
    %88 = math.tanh %87 : vector<8x32xf32>
    %89 = arith.mulf %84, %88 : vector<8x32xf32>
    %c2 = arith.constant 2 : index
    %c0_45 = arith.constant 0 : index
    %c0_46 = arith.constant 0 : index
    %90 = vector.load %arg0[%c2, %c0_45, %c0_46] : memref<8x8x1xf32, #tpu.memory_space<vmem>>, vector<1x8x1xf32>
    %91 = vector.shape_cast %90 : vector<1x8x1xf32> to vector<8x1xf32>
    %c0_47 = arith.constant 0 : index
    %c0_48 = arith.constant 0 : index
    %92 = vector.load %arg3[%c0_47, %c0_48] : memref<1x128xf32, #tpu.memory_space<vmem>>, vector<1x128xf32>
    %93 = vector.broadcast %91 : vector<8x1xf32> to vector<8x128xf32>
    %94 = vector.broadcast %92 : vector<1x128xf32> to vector<8x128xf32>
    %95 = arith.mulf %93, %94 : vector<8x128xf32>
    %c0_49 = arith.constant 0 : index
    %c0_50 = arith.constant 0 : index
    %96 = vector.load %arg7[%c0_49, %c0_50] : memref<1x128xf32, #tpu.memory_space<vmem>>, vector<1x128xf32>
    %97 = vector.broadcast %96 : vector<1x128xf32> to vector<8x128xf32>
    %98 = arith.addf %95, %97 : vector<8x128xf32>
    %c0_51 = arith.constant 0 : index
    %c0_52 = arith.constant 0 : index
    %99 = vector.load %arg4[%c0_51, %c0_52] : memref<32x128xf32, #tpu.memory_space<vmem>>, vector<32x128xf32>
    %cst_53 = arith.constant dense<0.000000e+00> : vector<8x128xf32>
    %100 = tpu.matmul %66, %99, %cst_53 {dimension_numbers = #tpu.dot_dimension_numbers<[1], [0], [0], [1], [0, 0, 1, 1], [], []>} : vector<8x32xf32>, vector<32x128xf32>, vector<8x128xf32> -> vector<8x128xf32>
    %101 = arith.addf %98, %100 : vector<8x128xf32>
    %102 = arith.negf %101 : vector<8x128xf32>
    %103 = math.exp %102 : vector<8x128xf32>
    %cst_54 = arith.constant 1.000000e+00 : f32
    %104 = vector.broadcast %cst_54 : f32 to vector<8x128xf32>
    %105 = arith.addf %104, %103 : vector<8x128xf32>
    %106 = arith.divf %104, %105 : vector<8x128xf32>
    %107 = math.tanh %101 : vector<8x128xf32>
    %108 = vector.extract_strided_slice %106 {offsets = [0, 0], sizes = [8, 32], strides = [1, 1]} : vector<8x128xf32> to vector<8x32xf32>
    %109 = vector.extract_strided_slice %106 {offsets = [0, 32], sizes = [8, 32], strides = [1, 1]} : vector<8x128xf32> to vector<8x32xf32>
    %110 = vector.extract_strided_slice %107 {offsets = [0, 64], sizes = [8, 32], strides = [1, 1]} : vector<8x128xf32> to vector<8x32xf32>
    %111 = vector.extract_strided_slice %106 {offsets = [0, 96], sizes = [8, 32], strides = [1, 1]} : vector<8x128xf32> to vector<8x32xf32>
    %112 = arith.mulf %109, %64 : vector<8x32xf32>
    %113 = arith.mulf %108, %110 : vector<8x32xf32>
    %114 = arith.addf %112, %113 : vector<8x32xf32>
    %115 = math.tanh %114 : vector<8x32xf32>
    %116 = arith.mulf %111, %115 : vector<8x32xf32>
    %c0_55 = arith.constant 0 : index
    %c0_56 = arith.constant 0 : index
    %117 = vector.load %arg5[%c0_55, %c0_56] : memref<32x128xf32, #tpu.memory_space<vmem>>, vector<32x128xf32>
    %cst_57 = arith.constant dense<0.000000e+00> : vector<8x128xf32>
    %118 = tpu.matmul %116, %117, %cst_57 {dimension_numbers = #tpu.dot_dimension_numbers<[1], [0], [0], [1], [0, 0, 1, 1], [], []>} : vector<8x32xf32>, vector<32x128xf32>, vector<8x128xf32> -> vector<8x128xf32>
    %c0_58 = arith.constant 0 : index
    %c0_59 = arith.constant 0 : index
    %119 = vector.load %arg8[%c0_58, %c0_59] : memref<1x128xf32, #tpu.memory_space<vmem>>, vector<1x128xf32>
    %120 = vector.broadcast %119 : vector<1x128xf32> to vector<8x128xf32>
    %121 = arith.addf %118, %120 : vector<8x128xf32>
    %c0_60 = arith.constant 0 : index
    %c0_61 = arith.constant 0 : index
    %122 = vector.load %arg6[%c0_60, %c0_61] : memref<32x128xf32, #tpu.memory_space<vmem>>, vector<32x128xf32>
    %cst_62 = arith.constant dense<0.000000e+00> : vector<8x128xf32>
    %123 = tpu.matmul %89, %122, %cst_62 {dimension_numbers = #tpu.dot_dimension_numbers<[1], [0], [0], [1], [0, 0, 1, 1], [], []>} : vector<8x32xf32>, vector<32x128xf32>, vector<8x128xf32> -> vector<8x128xf32>
    %124 = arith.addf %71, %123 : vector<8x128xf32>
    %125 = arith.negf %124 : vector<8x128xf32>
    %126 = math.exp %125 : vector<8x128xf32>
    %cst_63 = arith.constant 1.000000e+00 : f32
    %127 = vector.broadcast %cst_63 : f32 to vector<8x128xf32>
    %128 = arith.addf %127, %126 : vector<8x128xf32>
    %129 = arith.divf %127, %128 : vector<8x128xf32>
    %130 = math.tanh %124 : vector<8x128xf32>
    %131 = vector.extract_strided_slice %129 {offsets = [0, 0], sizes = [8, 32], strides = [1, 1]} : vector<8x128xf32> to vector<8x32xf32>
    %132 = vector.extract_strided_slice %129 {offsets = [0, 32], sizes = [8, 32], strides = [1, 1]} : vector<8x128xf32> to vector<8x32xf32>
    %133 = vector.extract_strided_slice %130 {offsets = [0, 64], sizes = [8, 32], strides = [1, 1]} : vector<8x128xf32> to vector<8x32xf32>
    %134 = vector.extract_strided_slice %129 {offsets = [0, 96], sizes = [8, 32], strides = [1, 1]} : vector<8x128xf32> to vector<8x32xf32>
    %135 = arith.mulf %132, %87 : vector<8x32xf32>
    %136 = arith.mulf %131, %133 : vector<8x32xf32>
    %137 = arith.addf %135, %136 : vector<8x32xf32>
    %138 = math.tanh %137 : vector<8x32xf32>
    %139 = arith.mulf %134, %138 : vector<8x32xf32>
    %c3 = arith.constant 3 : index
    %c0_64 = arith.constant 0 : index
    %c0_65 = arith.constant 0 : index
    %140 = vector.load %arg0[%c3, %c0_64, %c0_65] : memref<8x8x1xf32, #tpu.memory_space<vmem>>, vector<1x8x1xf32>
    %141 = vector.shape_cast %140 : vector<1x8x1xf32> to vector<8x1xf32>
    %c0_66 = arith.constant 0 : index
    %c0_67 = arith.constant 0 : index
    %142 = vector.load %arg3[%c0_66, %c0_67] : memref<1x128xf32, #tpu.memory_space<vmem>>, vector<1x128xf32>
    %143 = vector.broadcast %141 : vector<8x1xf32> to vector<8x128xf32>
    %144 = vector.broadcast %142 : vector<1x128xf32> to vector<8x128xf32>
    %145 = arith.mulf %143, %144 : vector<8x128xf32>
    %c0_68 = arith.constant 0 : index
    %c0_69 = arith.constant 0 : index
    %146 = vector.load %arg7[%c0_68, %c0_69] : memref<1x128xf32, #tpu.memory_space<vmem>>, vector<1x128xf32>
    %147 = vector.broadcast %146 : vector<1x128xf32> to vector<8x128xf32>
    %148 = arith.addf %145, %147 : vector<8x128xf32>
    %c0_70 = arith.constant 0 : index
    %c0_71 = arith.constant 0 : index
    %149 = vector.load %arg4[%c0_70, %c0_71] : memref<32x128xf32, #tpu.memory_space<vmem>>, vector<32x128xf32>
    %cst_72 = arith.constant dense<0.000000e+00> : vector<8x128xf32>
    %150 = tpu.matmul %116, %149, %cst_72 {dimension_numbers = #tpu.dot_dimension_numbers<[1], [0], [0], [1], [0, 0, 1, 1], [], []>} : vector<8x32xf32>, vector<32x128xf32>, vector<8x128xf32> -> vector<8x128xf32>
    %151 = arith.addf %148, %150 : vector<8x128xf32>
    %152 = arith.negf %151 : vector<8x128xf32>
    %153 = math.exp %152 : vector<8x128xf32>
    %cst_73 = arith.constant 1.000000e+00 : f32
    %154 = vector.broadcast %cst_73 : f32 to vector<8x128xf32>
    %155 = arith.addf %154, %153 : vector<8x128xf32>
    %156 = arith.divf %154, %155 : vector<8x128xf32>
    %157 = math.tanh %151 : vector<8x128xf32>
    %158 = vector.extract_strided_slice %156 {offsets = [0, 0], sizes = [8, 32], strides = [1, 1]} : vector<8x128xf32> to vector<8x32xf32>
    %159 = vector.extract_strided_slice %156 {offsets = [0, 32], sizes = [8, 32], strides = [1, 1]} : vector<8x128xf32> to vector<8x32xf32>
    %160 = vector.extract_strided_slice %157 {offsets = [0, 64], sizes = [8, 32], strides = [1, 1]} : vector<8x128xf32> to vector<8x32xf32>
    %161 = vector.extract_strided_slice %156 {offsets = [0, 96], sizes = [8, 32], strides = [1, 1]} : vector<8x128xf32> to vector<8x32xf32>
    %162 = arith.mulf %159, %114 : vector<8x32xf32>
    %163 = arith.mulf %158, %160 : vector<8x32xf32>
    %164 = arith.addf %162, %163 : vector<8x32xf32>
    %165 = math.tanh %164 : vector<8x32xf32>
    %166 = arith.mulf %161, %165 : vector<8x32xf32>
    %c0_74 = arith.constant 0 : index
    %c0_75 = arith.constant 0 : index
    %167 = vector.load %arg5[%c0_74, %c0_75] : memref<32x128xf32, #tpu.memory_space<vmem>>, vector<32x128xf32>
    %cst_76 = arith.constant dense<0.000000e+00> : vector<8x128xf32>
    %168 = tpu.matmul %166, %167, %cst_76 {dimension_numbers = #tpu.dot_dimension_numbers<[1], [0], [0], [1], [0, 0, 1, 1], [], []>} : vector<8x32xf32>, vector<32x128xf32>, vector<8x128xf32> -> vector<8x128xf32>
    %c0_77 = arith.constant 0 : index
    %c0_78 = arith.constant 0 : index
    %169 = vector.load %arg8[%c0_77, %c0_78] : memref<1x128xf32, #tpu.memory_space<vmem>>, vector<1x128xf32>
    %170 = vector.broadcast %169 : vector<1x128xf32> to vector<8x128xf32>
    %171 = arith.addf %168, %170 : vector<8x128xf32>
    %c0_79 = arith.constant 0 : index
    %c0_80 = arith.constant 0 : index
    %172 = vector.load %arg6[%c0_79, %c0_80] : memref<32x128xf32, #tpu.memory_space<vmem>>, vector<32x128xf32>
    %cst_81 = arith.constant dense<0.000000e+00> : vector<8x128xf32>
    %173 = tpu.matmul %139, %172, %cst_81 {dimension_numbers = #tpu.dot_dimension_numbers<[1], [0], [0], [1], [0, 0, 1, 1], [], []>} : vector<8x32xf32>, vector<32x128xf32>, vector<8x128xf32> -> vector<8x128xf32>
    %174 = arith.addf %121, %173 : vector<8x128xf32>
    %175 = arith.negf %174 : vector<8x128xf32>
    %176 = math.exp %175 : vector<8x128xf32>
    %cst_82 = arith.constant 1.000000e+00 : f32
    %177 = vector.broadcast %cst_82 : f32 to vector<8x128xf32>
    %178 = arith.addf %177, %176 : vector<8x128xf32>
    %179 = arith.divf %177, %178 : vector<8x128xf32>
    %180 = math.tanh %174 : vector<8x128xf32>
    %181 = vector.extract_strided_slice %179 {offsets = [0, 0], sizes = [8, 32], strides = [1, 1]} : vector<8x128xf32> to vector<8x32xf32>
    %182 = vector.extract_strided_slice %179 {offsets = [0, 32], sizes = [8, 32], strides = [1, 1]} : vector<8x128xf32> to vector<8x32xf32>
    %183 = vector.extract_strided_slice %180 {offsets = [0, 64], sizes = [8, 32], strides = [1, 1]} : vector<8x128xf32> to vector<8x32xf32>
    %184 = vector.extract_strided_slice %179 {offsets = [0, 96], sizes = [8, 32], strides = [1, 1]} : vector<8x128xf32> to vector<8x32xf32>
    %185 = arith.mulf %182, %137 : vector<8x32xf32>
    %186 = arith.mulf %181, %183 : vector<8x32xf32>
    %187 = arith.addf %185, %186 : vector<8x32xf32>
    %188 = math.tanh %187 : vector<8x32xf32>
    %189 = arith.mulf %184, %188 : vector<8x32xf32>
    %c4 = arith.constant 4 : index
    %c0_83 = arith.constant 0 : index
    %c0_84 = arith.constant 0 : index
    %190 = vector.load %arg0[%c4, %c0_83, %c0_84] : memref<8x8x1xf32, #tpu.memory_space<vmem>>, vector<1x8x1xf32>
    %191 = vector.shape_cast %190 : vector<1x8x1xf32> to vector<8x1xf32>
    %c0_85 = arith.constant 0 : index
    %c0_86 = arith.constant 0 : index
    %192 = vector.load %arg3[%c0_85, %c0_86] : memref<1x128xf32, #tpu.memory_space<vmem>>, vector<1x128xf32>
    %193 = vector.broadcast %191 : vector<8x1xf32> to vector<8x128xf32>
    %194 = vector.broadcast %192 : vector<1x128xf32> to vector<8x128xf32>
    %195 = arith.mulf %193, %194 : vector<8x128xf32>
    %c0_87 = arith.constant 0 : index
    %c0_88 = arith.constant 0 : index
    %196 = vector.load %arg7[%c0_87, %c0_88] : memref<1x128xf32, #tpu.memory_space<vmem>>, vector<1x128xf32>
    %197 = vector.broadcast %196 : vector<1x128xf32> to vector<8x128xf32>
    %198 = arith.addf %195, %197 : vector<8x128xf32>
    %c0_89 = arith.constant 0 : index
    %c0_90 = arith.constant 0 : index
    %199 = vector.load %arg4[%c0_89, %c0_90] : memref<32x128xf32, #tpu.memory_space<vmem>>, vector<32x128xf32>
    %cst_91 = arith.constant dense<0.000000e+00> : vector<8x128xf32>
    %200 = tpu.matmul %166, %199, %cst_91 {dimension_numbers = #tpu.dot_dimension_numbers<[1], [0], [0], [1], [0, 0, 1, 1], [], []>} : vector<8x32xf32>, vector<32x128xf32>, vector<8x128xf32> -> vector<8x128xf32>
    %201 = arith.addf %198, %200 : vector<8x128xf32>
    %202 = arith.negf %201 : vector<8x128xf32>
    %203 = math.exp %202 : vector<8x128xf32>
    %cst_92 = arith.constant 1.000000e+00 : f32
    %204 = vector.broadcast %cst_92 : f32 to vector<8x128xf32>
    %205 = arith.addf %204, %203 : vector<8x128xf32>
    %206 = arith.divf %204, %205 : vector<8x128xf32>
    %207 = math.tanh %201 : vector<8x128xf32>
    %208 = vector.extract_strided_slice %206 {offsets = [0, 0], sizes = [8, 32], strides = [1, 1]} : vector<8x128xf32> to vector<8x32xf32>
    %209 = vector.extract_strided_slice %206 {offsets = [0, 32], sizes = [8, 32], strides = [1, 1]} : vector<8x128xf32> to vector<8x32xf32>
    %210 = vector.extract_strided_slice %207 {offsets = [0, 64], sizes = [8, 32], strides = [1, 1]} : vector<8x128xf32> to vector<8x32xf32>
    %211 = vector.extract_strided_slice %206 {offsets = [0, 96], sizes = [8, 32], strides = [1, 1]} : vector<8x128xf32> to vector<8x32xf32>
    %212 = arith.mulf %209, %164 : vector<8x32xf32>
    %213 = arith.mulf %208, %210 : vector<8x32xf32>
    %214 = arith.addf %212, %213 : vector<8x32xf32>
    %215 = math.tanh %214 : vector<8x32xf32>
    %216 = arith.mulf %211, %215 : vector<8x32xf32>
    %c0_93 = arith.constant 0 : index
    %c0_94 = arith.constant 0 : index
    %217 = vector.load %arg5[%c0_93, %c0_94] : memref<32x128xf32, #tpu.memory_space<vmem>>, vector<32x128xf32>
    %cst_95 = arith.constant dense<0.000000e+00> : vector<8x128xf32>
    %218 = tpu.matmul %216, %217, %cst_95 {dimension_numbers = #tpu.dot_dimension_numbers<[1], [0], [0], [1], [0, 0, 1, 1], [], []>} : vector<8x32xf32>, vector<32x128xf32>, vector<8x128xf32> -> vector<8x128xf32>
    %c0_96 = arith.constant 0 : index
    %c0_97 = arith.constant 0 : index
    %219 = vector.load %arg8[%c0_96, %c0_97] : memref<1x128xf32, #tpu.memory_space<vmem>>, vector<1x128xf32>
    %220 = vector.broadcast %219 : vector<1x128xf32> to vector<8x128xf32>
    %221 = arith.addf %218, %220 : vector<8x128xf32>
    %c0_98 = arith.constant 0 : index
    %c0_99 = arith.constant 0 : index
    %222 = vector.load %arg6[%c0_98, %c0_99] : memref<32x128xf32, #tpu.memory_space<vmem>>, vector<32x128xf32>
    %cst_100 = arith.constant dense<0.000000e+00> : vector<8x128xf32>
    %223 = tpu.matmul %189, %222, %cst_100 {dimension_numbers = #tpu.dot_dimension_numbers<[1], [0], [0], [1], [0, 0, 1, 1], [], []>} : vector<8x32xf32>, vector<32x128xf32>, vector<8x128xf32> -> vector<8x128xf32>
    %224 = arith.addf %171, %223 : vector<8x128xf32>
    %225 = arith.negf %224 : vector<8x128xf32>
    %226 = math.exp %225 : vector<8x128xf32>
    %cst_101 = arith.constant 1.000000e+00 : f32
    %227 = vector.broadcast %cst_101 : f32 to vector<8x128xf32>
    %228 = arith.addf %227, %226 : vector<8x128xf32>
    %229 = arith.divf %227, %228 : vector<8x128xf32>
    %230 = math.tanh %224 : vector<8x128xf32>
    %231 = vector.extract_strided_slice %229 {offsets = [0, 0], sizes = [8, 32], strides = [1, 1]} : vector<8x128xf32> to vector<8x32xf32>
    %232 = vector.extract_strided_slice %229 {offsets = [0, 32], sizes = [8, 32], strides = [1, 1]} : vector<8x128xf32> to vector<8x32xf32>
    %233 = vector.extract_strided_slice %230 {offsets = [0, 64], sizes = [8, 32], strides = [1, 1]} : vector<8x128xf32> to vector<8x32xf32>
    %234 = vector.extract_strided_slice %229 {offsets = [0, 96], sizes = [8, 32], strides = [1, 1]} : vector<8x128xf32> to vector<8x32xf32>
    %235 = arith.mulf %232, %187 : vector<8x32xf32>
    %236 = arith.mulf %231, %233 : vector<8x32xf32>
    %237 = arith.addf %235, %236 : vector<8x32xf32>
    %238 = math.tanh %237 : vector<8x32xf32>
    %239 = arith.mulf %234, %238 : vector<8x32xf32>
    %c5 = arith.constant 5 : index
    %c0_102 = arith.constant 0 : index
    %c0_103 = arith.constant 0 : index
    %240 = vector.load %arg0[%c5, %c0_102, %c0_103] : memref<8x8x1xf32, #tpu.memory_space<vmem>>, vector<1x8x1xf32>
    %241 = vector.shape_cast %240 : vector<1x8x1xf32> to vector<8x1xf32>
    %c0_104 = arith.constant 0 : index
    %c0_105 = arith.constant 0 : index
    %242 = vector.load %arg3[%c0_104, %c0_105] : memref<1x128xf32, #tpu.memory_space<vmem>>, vector<1x128xf32>
    %243 = vector.broadcast %241 : vector<8x1xf32> to vector<8x128xf32>
    %244 = vector.broadcast %242 : vector<1x128xf32> to vector<8x128xf32>
    %245 = arith.mulf %243, %244 : vector<8x128xf32>
    %c0_106 = arith.constant 0 : index
    %c0_107 = arith.constant 0 : index
    %246 = vector.load %arg7[%c0_106, %c0_107] : memref<1x128xf32, #tpu.memory_space<vmem>>, vector<1x128xf32>
    %247 = vector.broadcast %246 : vector<1x128xf32> to vector<8x128xf32>
    %248 = arith.addf %245, %247 : vector<8x128xf32>
    %c0_108 = arith.constant 0 : index
    %c0_109 = arith.constant 0 : index
    %249 = vector.load %arg4[%c0_108, %c0_109] : memref<32x128xf32, #tpu.memory_space<vmem>>, vector<32x128xf32>
    %cst_110 = arith.constant dense<0.000000e+00> : vector<8x128xf32>
    %250 = tpu.matmul %216, %249, %cst_110 {dimension_numbers = #tpu.dot_dimension_numbers<[1], [0], [0], [1], [0, 0, 1, 1], [], []>} : vector<8x32xf32>, vector<32x128xf32>, vector<8x128xf32> -> vector<8x128xf32>
    %251 = arith.addf %248, %250 : vector<8x128xf32>
    %252 = arith.negf %251 : vector<8x128xf32>
    %253 = math.exp %252 : vector<8x128xf32>
    %cst_111 = arith.constant 1.000000e+00 : f32
    %254 = vector.broadcast %cst_111 : f32 to vector<8x128xf32>
    %255 = arith.addf %254, %253 : vector<8x128xf32>
    %256 = arith.divf %254, %255 : vector<8x128xf32>
    %257 = math.tanh %251 : vector<8x128xf32>
    %258 = vector.extract_strided_slice %256 {offsets = [0, 0], sizes = [8, 32], strides = [1, 1]} : vector<8x128xf32> to vector<8x32xf32>
    %259 = vector.extract_strided_slice %256 {offsets = [0, 32], sizes = [8, 32], strides = [1, 1]} : vector<8x128xf32> to vector<8x32xf32>
    %260 = vector.extract_strided_slice %257 {offsets = [0, 64], sizes = [8, 32], strides = [1, 1]} : vector<8x128xf32> to vector<8x32xf32>
    %261 = vector.extract_strided_slice %256 {offsets = [0, 96], sizes = [8, 32], strides = [1, 1]} : vector<8x128xf32> to vector<8x32xf32>
    %262 = arith.mulf %259, %214 : vector<8x32xf32>
    %263 = arith.mulf %258, %260 : vector<8x32xf32>
    %264 = arith.addf %262, %263 : vector<8x32xf32>
    %265 = math.tanh %264 : vector<8x32xf32>
    %266 = arith.mulf %261, %265 : vector<8x32xf32>
    %c0_112 = arith.constant 0 : index
    %c0_113 = arith.constant 0 : index
    %267 = vector.load %arg5[%c0_112, %c0_113] : memref<32x128xf32, #tpu.memory_space<vmem>>, vector<32x128xf32>
    %cst_114 = arith.constant dense<0.000000e+00> : vector<8x128xf32>
    %268 = tpu.matmul %266, %267, %cst_114 {dimension_numbers = #tpu.dot_dimension_numbers<[1], [0], [0], [1], [0, 0, 1, 1], [], []>} : vector<8x32xf32>, vector<32x128xf32>, vector<8x128xf32> -> vector<8x128xf32>
    %c0_115 = arith.constant 0 : index
    %c0_116 = arith.constant 0 : index
    %269 = vector.load %arg8[%c0_115, %c0_116] : memref<1x128xf32, #tpu.memory_space<vmem>>, vector<1x128xf32>
    %270 = vector.broadcast %269 : vector<1x128xf32> to vector<8x128xf32>
    %271 = arith.addf %268, %270 : vector<8x128xf32>
    %c0_117 = arith.constant 0 : index
    %c0_118 = arith.constant 0 : index
    %272 = vector.load %arg6[%c0_117, %c0_118] : memref<32x128xf32, #tpu.memory_space<vmem>>, vector<32x128xf32>
    %cst_119 = arith.constant dense<0.000000e+00> : vector<8x128xf32>
    %273 = tpu.matmul %239, %272, %cst_119 {dimension_numbers = #tpu.dot_dimension_numbers<[1], [0], [0], [1], [0, 0, 1, 1], [], []>} : vector<8x32xf32>, vector<32x128xf32>, vector<8x128xf32> -> vector<8x128xf32>
    %274 = arith.addf %221, %273 : vector<8x128xf32>
    %275 = arith.negf %274 : vector<8x128xf32>
    %276 = math.exp %275 : vector<8x128xf32>
    %cst_120 = arith.constant 1.000000e+00 : f32
    %277 = vector.broadcast %cst_120 : f32 to vector<8x128xf32>
    %278 = arith.addf %277, %276 : vector<8x128xf32>
    %279 = arith.divf %277, %278 : vector<8x128xf32>
    %280 = math.tanh %274 : vector<8x128xf32>
    %281 = vector.extract_strided_slice %279 {offsets = [0, 0], sizes = [8, 32], strides = [1, 1]} : vector<8x128xf32> to vector<8x32xf32>
    %282 = vector.extract_strided_slice %279 {offsets = [0, 32], sizes = [8, 32], strides = [1, 1]} : vector<8x128xf32> to vector<8x32xf32>
    %283 = vector.extract_strided_slice %280 {offsets = [0, 64], sizes = [8, 32], strides = [1, 1]} : vector<8x128xf32> to vector<8x32xf32>
    %284 = vector.extract_strided_slice %279 {offsets = [0, 96], sizes = [8, 32], strides = [1, 1]} : vector<8x128xf32> to vector<8x32xf32>
    %285 = arith.mulf %282, %237 : vector<8x32xf32>
    %286 = arith.mulf %281, %283 : vector<8x32xf32>
    %287 = arith.addf %285, %286 : vector<8x32xf32>
    %288 = math.tanh %287 : vector<8x32xf32>
    %289 = arith.mulf %284, %288 : vector<8x32xf32>
    %c6 = arith.constant 6 : index
    %c0_121 = arith.constant 0 : index
    %c0_122 = arith.constant 0 : index
    %290 = vector.load %arg0[%c6, %c0_121, %c0_122] : memref<8x8x1xf32, #tpu.memory_space<vmem>>, vector<1x8x1xf32>
    %291 = vector.shape_cast %290 : vector<1x8x1xf32> to vector<8x1xf32>
    %c0_123 = arith.constant 0 : index
    %c0_124 = arith.constant 0 : index
    %292 = vector.load %arg3[%c0_123, %c0_124] : memref<1x128xf32, #tpu.memory_space<vmem>>, vector<1x128xf32>
    %293 = vector.broadcast %291 : vector<8x1xf32> to vector<8x128xf32>
    %294 = vector.broadcast %292 : vector<1x128xf32> to vector<8x128xf32>
    %295 = arith.mulf %293, %294 : vector<8x128xf32>
    %c0_125 = arith.constant 0 : index
    %c0_126 = arith.constant 0 : index
    %296 = vector.load %arg7[%c0_125, %c0_126] : memref<1x128xf32, #tpu.memory_space<vmem>>, vector<1x128xf32>
    %297 = vector.broadcast %296 : vector<1x128xf32> to vector<8x128xf32>
    %298 = arith.addf %295, %297 : vector<8x128xf32>
    %c0_127 = arith.constant 0 : index
    %c0_128 = arith.constant 0 : index
    %299 = vector.load %arg4[%c0_127, %c0_128] : memref<32x128xf32, #tpu.memory_space<vmem>>, vector<32x128xf32>
    %cst_129 = arith.constant dense<0.000000e+00> : vector<8x128xf32>
    %300 = tpu.matmul %266, %299, %cst_129 {dimension_numbers = #tpu.dot_dimension_numbers<[1], [0], [0], [1], [0, 0, 1, 1], [], []>} : vector<8x32xf32>, vector<32x128xf32>, vector<8x128xf32> -> vector<8x128xf32>
    %301 = arith.addf %298, %300 : vector<8x128xf32>
    %302 = arith.negf %301 : vector<8x128xf32>
    %303 = math.exp %302 : vector<8x128xf32>
    %cst_130 = arith.constant 1.000000e+00 : f32
    %304 = vector.broadcast %cst_130 : f32 to vector<8x128xf32>
    %305 = arith.addf %304, %303 : vector<8x128xf32>
    %306 = arith.divf %304, %305 : vector<8x128xf32>
    %307 = math.tanh %301 : vector<8x128xf32>
    %308 = vector.extract_strided_slice %306 {offsets = [0, 0], sizes = [8, 32], strides = [1, 1]} : vector<8x128xf32> to vector<8x32xf32>
    %309 = vector.extract_strided_slice %306 {offsets = [0, 32], sizes = [8, 32], strides = [1, 1]} : vector<8x128xf32> to vector<8x32xf32>
    %310 = vector.extract_strided_slice %307 {offsets = [0, 64], sizes = [8, 32], strides = [1, 1]} : vector<8x128xf32> to vector<8x32xf32>
    %311 = vector.extract_strided_slice %306 {offsets = [0, 96], sizes = [8, 32], strides = [1, 1]} : vector<8x128xf32> to vector<8x32xf32>
    %312 = arith.mulf %309, %264 : vector<8x32xf32>
    %313 = arith.mulf %308, %310 : vector<8x32xf32>
    %314 = arith.addf %312, %313 : vector<8x32xf32>
    %315 = math.tanh %314 : vector<8x32xf32>
    %316 = arith.mulf %311, %315 : vector<8x32xf32>
    %c0_131 = arith.constant 0 : index
    %c0_132 = arith.constant 0 : index
    %317 = vector.load %arg5[%c0_131, %c0_132] : memref<32x128xf32, #tpu.memory_space<vmem>>, vector<32x128xf32>
    %cst_133 = arith.constant dense<0.000000e+00> : vector<8x128xf32>
    %318 = tpu.matmul %316, %317, %cst_133 {dimension_numbers = #tpu.dot_dimension_numbers<[1], [0], [0], [1], [0, 0, 1, 1], [], []>} : vector<8x32xf32>, vector<32x128xf32>, vector<8x128xf32> -> vector<8x128xf32>
    %c0_134 = arith.constant 0 : index
    %c0_135 = arith.constant 0 : index
    %319 = vector.load %arg8[%c0_134, %c0_135] : memref<1x128xf32, #tpu.memory_space<vmem>>, vector<1x128xf32>
    %320 = vector.broadcast %319 : vector<1x128xf32> to vector<8x128xf32>
    %321 = arith.addf %318, %320 : vector<8x128xf32>
    %c0_136 = arith.constant 0 : index
    %c0_137 = arith.constant 0 : index
    %322 = vector.load %arg6[%c0_136, %c0_137] : memref<32x128xf32, #tpu.memory_space<vmem>>, vector<32x128xf32>
    %cst_138 = arith.constant dense<0.000000e+00> : vector<8x128xf32>
    %323 = tpu.matmul %289, %322, %cst_138 {dimension_numbers = #tpu.dot_dimension_numbers<[1], [0], [0], [1], [0, 0, 1, 1], [], []>} : vector<8x32xf32>, vector<32x128xf32>, vector<8x128xf32> -> vector<8x128xf32>
    %324 = arith.addf %271, %323 : vector<8x128xf32>
    %325 = arith.negf %324 : vector<8x128xf32>
    %326 = math.exp %325 : vector<8x128xf32>
    %cst_139 = arith.constant 1.000000e+00 : f32
    %327 = vector.broadcast %cst_139 : f32 to vector<8x128xf32>
    %328 = arith.addf %327, %326 : vector<8x128xf32>
    %329 = arith.divf %327, %328 : vector<8x128xf32>
    %330 = math.tanh %324 : vector<8x128xf32>
    %331 = vector.extract_strided_slice %329 {offsets = [0, 0], sizes = [8, 32], strides = [1, 1]} : vector<8x128xf32> to vector<8x32xf32>
    %332 = vector.extract_strided_slice %329 {offsets = [0, 32], sizes = [8, 32], strides = [1, 1]} : vector<8x128xf32> to vector<8x32xf32>
    %333 = vector.extract_strided_slice %330 {offsets = [0, 64], sizes = [8, 32], strides = [1, 1]} : vector<8x128xf32> to vector<8x32xf32>
    %334 = vector.extract_strided_slice %329 {offsets = [0, 96], sizes = [8, 32], strides = [1, 1]} : vector<8x128xf32> to vector<8x32xf32>
    %335 = arith.mulf %332, %287 : vector<8x32xf32>
    %336 = arith.mulf %331, %333 : vector<8x32xf32>
    %337 = arith.addf %335, %336 : vector<8x32xf32>
    %338 = math.tanh %337 : vector<8x32xf32>
    %339 = arith.mulf %334, %338 : vector<8x32xf32>
    %c7 = arith.constant 7 : index
    %c0_140 = arith.constant 0 : index
    %c0_141 = arith.constant 0 : index
    %340 = vector.load %arg0[%c7, %c0_140, %c0_141] : memref<8x8x1xf32, #tpu.memory_space<vmem>>, vector<1x8x1xf32>
    %341 = vector.shape_cast %340 : vector<1x8x1xf32> to vector<8x1xf32>
    %c0_142 = arith.constant 0 : index
    %c0_143 = arith.constant 0 : index
    %342 = vector.load %arg3[%c0_142, %c0_143] : memref<1x128xf32, #tpu.memory_space<vmem>>, vector<1x128xf32>
    %343 = vector.broadcast %341 : vector<8x1xf32> to vector<8x128xf32>
    %344 = vector.broadcast %342 : vector<1x128xf32> to vector<8x128xf32>
    %345 = arith.mulf %343, %344 : vector<8x128xf32>
    %c0_144 = arith.constant 0 : index
    %c0_145 = arith.constant 0 : index
    %346 = vector.load %arg7[%c0_144, %c0_145] : memref<1x128xf32, #tpu.memory_space<vmem>>, vector<1x128xf32>
    %347 = vector.broadcast %346 : vector<1x128xf32> to vector<8x128xf32>
    %348 = arith.addf %345, %347 : vector<8x128xf32>
    %c0_146 = arith.constant 0 : index
    %c0_147 = arith.constant 0 : index
    %349 = vector.load %arg4[%c0_146, %c0_147] : memref<32x128xf32, #tpu.memory_space<vmem>>, vector<32x128xf32>
    %cst_148 = arith.constant dense<0.000000e+00> : vector<8x128xf32>
    %350 = tpu.matmul %316, %349, %cst_148 {dimension_numbers = #tpu.dot_dimension_numbers<[1], [0], [0], [1], [0, 0, 1, 1], [], []>} : vector<8x32xf32>, vector<32x128xf32>, vector<8x128xf32> -> vector<8x128xf32>
    %351 = arith.addf %348, %350 : vector<8x128xf32>
    %352 = arith.negf %351 : vector<8x128xf32>
    %353 = math.exp %352 : vector<8x128xf32>
    %cst_149 = arith.constant 1.000000e+00 : f32
    %354 = vector.broadcast %cst_149 : f32 to vector<8x128xf32>
    %355 = arith.addf %354, %353 : vector<8x128xf32>
    %356 = arith.divf %354, %355 : vector<8x128xf32>
    %357 = math.tanh %351 : vector<8x128xf32>
    %358 = vector.extract_strided_slice %356 {offsets = [0, 0], sizes = [8, 32], strides = [1, 1]} : vector<8x128xf32> to vector<8x32xf32>
    %359 = vector.extract_strided_slice %356 {offsets = [0, 32], sizes = [8, 32], strides = [1, 1]} : vector<8x128xf32> to vector<8x32xf32>
    %360 = vector.extract_strided_slice %357 {offsets = [0, 64], sizes = [8, 32], strides = [1, 1]} : vector<8x128xf32> to vector<8x32xf32>
    %361 = vector.extract_strided_slice %356 {offsets = [0, 96], sizes = [8, 32], strides = [1, 1]} : vector<8x128xf32> to vector<8x32xf32>
    %362 = arith.mulf %359, %314 : vector<8x32xf32>
    %363 = arith.mulf %358, %360 : vector<8x32xf32>
    %364 = arith.addf %362, %363 : vector<8x32xf32>
    %365 = math.tanh %364 : vector<8x32xf32>
    %366 = arith.mulf %361, %365 : vector<8x32xf32>
    %c0_150 = arith.constant 0 : index
    %c0_151 = arith.constant 0 : index
    %367 = vector.load %arg5[%c0_150, %c0_151] : memref<32x128xf32, #tpu.memory_space<vmem>>, vector<32x128xf32>
    %cst_152 = arith.constant dense<0.000000e+00> : vector<8x128xf32>
    %368 = tpu.matmul %366, %367, %cst_152 {dimension_numbers = #tpu.dot_dimension_numbers<[1], [0], [0], [1], [0, 0, 1, 1], [], []>} : vector<8x32xf32>, vector<32x128xf32>, vector<8x128xf32> -> vector<8x128xf32>
    %c0_153 = arith.constant 0 : index
    %c0_154 = arith.constant 0 : index
    %369 = vector.load %arg8[%c0_153, %c0_154] : memref<1x128xf32, #tpu.memory_space<vmem>>, vector<1x128xf32>
    %370 = vector.broadcast %369 : vector<1x128xf32> to vector<8x128xf32>
    %371 = arith.addf %368, %370 : vector<8x128xf32>
    %c0_155 = arith.constant 0 : index
    %c0_156 = arith.constant 0 : index
    %372 = vector.load %arg6[%c0_155, %c0_156] : memref<32x128xf32, #tpu.memory_space<vmem>>, vector<32x128xf32>
    %cst_157 = arith.constant dense<0.000000e+00> : vector<8x128xf32>
    %373 = tpu.matmul %339, %372, %cst_157 {dimension_numbers = #tpu.dot_dimension_numbers<[1], [0], [0], [1], [0, 0, 1, 1], [], []>} : vector<8x32xf32>, vector<32x128xf32>, vector<8x128xf32> -> vector<8x128xf32>
    %374 = arith.addf %321, %373 : vector<8x128xf32>
    %375 = arith.negf %374 : vector<8x128xf32>
    %376 = math.exp %375 : vector<8x128xf32>
    %cst_158 = arith.constant 1.000000e+00 : f32
    %377 = vector.broadcast %cst_158 : f32 to vector<8x128xf32>
    %378 = arith.addf %377, %376 : vector<8x128xf32>
    %379 = arith.divf %377, %378 : vector<8x128xf32>
    %380 = math.tanh %374 : vector<8x128xf32>
    %381 = vector.extract_strided_slice %379 {offsets = [0, 0], sizes = [8, 32], strides = [1, 1]} : vector<8x128xf32> to vector<8x32xf32>
    %382 = vector.extract_strided_slice %379 {offsets = [0, 32], sizes = [8, 32], strides = [1, 1]} : vector<8x128xf32> to vector<8x32xf32>
    %383 = vector.extract_strided_slice %380 {offsets = [0, 64], sizes = [8, 32], strides = [1, 1]} : vector<8x128xf32> to vector<8x32xf32>
    %384 = vector.extract_strided_slice %379 {offsets = [0, 96], sizes = [8, 32], strides = [1, 1]} : vector<8x128xf32> to vector<8x32xf32>
    %385 = arith.mulf %382, %337 : vector<8x32xf32>
    %386 = arith.mulf %381, %383 : vector<8x32xf32>
    %387 = arith.addf %385, %386 : vector<8x32xf32>
    %388 = math.tanh %387 : vector<8x32xf32>
    %389 = arith.mulf %384, %388 : vector<8x32xf32>
    %c0_159 = arith.constant 0 : index
    %c0_160 = arith.constant 0 : index
    %390 = vector.load %arg6[%c0_159, %c0_160] : memref<32x128xf32, #tpu.memory_space<vmem>>, vector<32x128xf32>
    %cst_161 = arith.constant dense<0.000000e+00> : vector<8x128xf32>
    %391 = tpu.matmul %389, %390, %cst_161 {dimension_numbers = #tpu.dot_dimension_numbers<[1], [0], [0], [1], [0, 0, 1, 1], [], []>} : vector<8x32xf32>, vector<32x128xf32>, vector<8x128xf32> -> vector<8x128xf32>
    %392 = arith.addf %371, %391 : vector<8x128xf32>
    %393 = arith.negf %392 : vector<8x128xf32>
    %394 = math.exp %393 : vector<8x128xf32>
    %cst_162 = arith.constant 1.000000e+00 : f32
    %395 = vector.broadcast %cst_162 : f32 to vector<8x128xf32>
    %396 = arith.addf %395, %394 : vector<8x128xf32>
    %397 = arith.divf %395, %396 : vector<8x128xf32>
    %398 = math.tanh %392 : vector<8x128xf32>
    %399 = vector.extract_strided_slice %397 {offsets = [0, 0], sizes = [8, 32], strides = [1, 1]} : vector<8x128xf32> to vector<8x32xf32>
    %400 = vector.extract_strided_slice %397 {offsets = [0, 32], sizes = [8, 32], strides = [1, 1]} : vector<8x128xf32> to vector<8x32xf32>
    %401 = vector.extract_strided_slice %398 {offsets = [0, 64], sizes = [8, 32], strides = [1, 1]} : vector<8x128xf32> to vector<8x32xf32>
    %402 = vector.extract_strided_slice %397 {offsets = [0, 96], sizes = [8, 32], strides = [1, 1]} : vector<8x128xf32> to vector<8x32xf32>
    %403 = arith.mulf %400, %387 : vector<8x32xf32>
    %404 = arith.mulf %399, %401 : vector<8x32xf32>
    %405 = arith.addf %403, %404 : vector<8x32xf32>
    %406 = math.tanh %405 : vector<8x32xf32>
    %407 = arith.mulf %402, %406 : vector<8x32xf32>
    %c0_163 = arith.constant 0 : index
    %c0_164 = arith.constant 0 : index
    %c0_165 = arith.constant 0 : index
    %408 = vector.load %arg12[%c0_163, %c0_164, %c0_165] : memref<2x8x32xf32, #tpu.memory_space<vmem>>, vector<1x8x32xf32>
    %409 = vector.shape_cast %408 : vector<1x8x32xf32> to vector<8x32xf32>
    %410 = vector.shape_cast %366 : vector<8x32xf32> to vector<1x8x32xf32>
    tpu.vector_store %arg12[%c0_163, %c0_164, %c0_165], %410 {strides = array<i32>} : memref<2x8x32xf32, #tpu.memory_space<vmem>>, vector<1x8x32xf32>,
    %c0_166 = arith.constant 0 : index
    %c0_167 = arith.constant 0 : index
    %c0_168 = arith.constant 0 : index
    %411 = vector.load %arg13[%c0_166, %c0_167, %c0_168] : memref<2x8x32xf32, #tpu.memory_space<vmem>>, vector<1x8x32xf32>
    %412 = vector.shape_cast %411 : vector<1x8x32xf32> to vector<8x32xf32>
    %413 = vector.shape_cast %364 : vector<8x32xf32> to vector<1x8x32xf32>
    tpu.vector_store %arg13[%c0_166, %c0_167, %c0_168], %413 {strides = array<i32>} : memref<2x8x32xf32, #tpu.memory_space<vmem>>, vector<1x8x32xf32>,
    %c1_169 = arith.constant 1 : index
    %c0_170 = arith.constant 0 : index
    %c0_171 = arith.constant 0 : index
    %414 = vector.load %arg12[%c1_169, %c0_170, %c0_171] : memref<2x8x32xf32, #tpu.memory_space<vmem>>, vector<1x8x32xf32>
    %415 = vector.shape_cast %414 : vector<1x8x32xf32> to vector<8x32xf32>
    %416 = vector.shape_cast %407 : vector<8x32xf32> to vector<1x8x32xf32>
    tpu.vector_store %arg12[%c1_169, %c0_170, %c0_171], %416 {strides = array<i32>} : memref<2x8x32xf32, #tpu.memory_space<vmem>>, vector<1x8x32xf32>,
    %c1_172 = arith.constant 1 : index
    %c0_173 = arith.constant 0 : index
    %c0_174 = arith.constant 0 : index
    %417 = vector.load %arg13[%c1_172, %c0_173, %c0_174] : memref<2x8x32xf32, #tpu.memory_space<vmem>>, vector<1x8x32xf32>
    %418 = vector.shape_cast %417 : vector<1x8x32xf32> to vector<8x32xf32>
    %419 = vector.shape_cast %405 : vector<8x32xf32> to vector<1x8x32xf32>
    tpu.vector_store %arg13[%c1_172, %c0_173, %c0_174], %419 {strides = array<i32>} : memref<2x8x32xf32, #tpu.memory_space<vmem>>, vector<1x8x32xf32>,
    %c0_175 = arith.constant 0 : index
    %c0_176 = arith.constant 0 : index
    %420 = vector.load %arg9[%c0_175, %c0_176] : memref<1x32xf32, #tpu.memory_space<vmem>>, vector<1x32xf32>
    %421 = vector.broadcast %420 : vector<1x32xf32> to vector<8x32xf32>
    %422 = arith.mulf %407, %421 : vector<8x32xf32>
    %cst_177 = arith.constant dense<0.000000e+00> : vector<8xf32>
    %423 = vector.multi_reduction <add>, %422, %cst_177 [1] : vector<8x32xf32> to vector<8xf32>
    %424 = vector.shape_cast %423 : vector<8xf32> to vector<8x1xf32>
    %c0_178 = arith.constant 0 : index
    %c0_179 = arith.constant 0 : index
    %425 = vector.load %arg10[%c0_178, %c0_179] : memref<1x1xf32, #tpu.memory_space<vmem>>, vector<1x1xf32>
    %426 = vector.broadcast %425 : vector<1x1xf32> to vector<8x1xf32>
    %427 = arith.addf %424, %426 : vector<8x1xf32>
    %428 = arith.negf %427 : vector<8x1xf32>
    %429 = math.exp %428 : vector<8x1xf32>
    %cst_180 = arith.constant 1.000000e+00 : f32
    %430 = vector.broadcast %cst_180 : f32 to vector<8x1xf32>
    %431 = arith.addf %430, %429 : vector<8x1xf32>
    %432 = arith.divf %430, %431 : vector<8x1xf32>
    %c0_181 = arith.constant 0 : index
    %c0_182 = arith.constant 0 : index
    %433 = vector.load %arg11[%c0_181, %c0_182] : memref<8x1xf32, #tpu.memory_space<vmem>>, vector<8x1xf32>
    tpu.vector_store %arg11[%c0_181, %c0_182], %432 {strides = array<i32>} : memref<8x1xf32, #tpu.memory_space<vmem>>, vector<8x1xf32>,
    return
  }
}

</mosaic_0001>

<bundles_post_ra>
// kernel: lt.0
= control target key start
LH: loop header
LB: loop body
LE: loop exit
PB: predicated region body
PF: predicated region fallthrough
CT: control target
= control target key end

     0   :  { %v34_v4 = vmov 0   ;;  %s68_s0 = inlined_call_operand.vmem [shape: f32[2,8,1], index: 0, kind: input, shape index: {}]   ;;  %s69_s1 = inlined_call_operand.vmem [shape: f32[2,8,1], index: 1, kind: input, shape index: {}]   ;;  %s70_s2 = inlined_call_operand.vmem [shape: pred[2,8,1], index: 2, kind: output, shape index: {}]  }
   0x1   :  { %v3_v0 = vld [vmem:[%s68_s0] sm:$0x1]  ;;  %v30_v2 = vld [vmem:[%s68_s0 + $0x1] sm:$0x1] }
   0x2   :  { %v4_v1 = vld [vmem:[%s69_s1] sm:$0x1]  ;;  %v31_v3 = vld [vmem:[%s69_s1 + $0x1] sm:$0x1] }
   0x3   :  { %vm7_vm0 = vcmp.lt.f32.partialorder %v3_v0, %v4_v1  ;;  %vm21_vm1 = vcmp.lt.f32.partialorder %v30_v2, %v31_v3 }
   0x4   :  { %v8_v5 = vsel %vm7_vm0, 1, %v34_v4  ;;  %v22_v7 = vsel %vm21_vm1, 1, %v34_v4 }
   0x5   :  { %v10_v6 = vpack.c.b16 0, %v8_v5  ;;  %v25_v8 = vpack.c.b16 0, %v22_v7 }
   0x7   :  { %v11_v9 = vpack.c.b8 0, %v10_v6  ;;  %v26_v10 = vpack.c.b8 0, %v25_v8 }
   0x9   :  { %14 = vst [vmem:[%s70_s2] sm:$0x1] %v11_v9 }
   0xa   :  { %32 = vst [vmem:[%s70_s2 + $0x1] sm:$0x1] %v26_v10 }

// kernel: lstm_classifier_forward.1
= control target key start
LH: loop header
LB: loop body
LE: loop exit
PB: predicated region body
PF: predicated region fallthrough
CT: control target
= control target key end

     0   :  { %v1594_v2 = vmov 0   ;;  %s1595_s18 = smov 32   ;;  %vm69_vm0 = vcmask 261120   ;;  %s1596_s26 = smov 64   ;;  %s2092_s4 = inlined_call_operand.vmem [shape: f32[32,128], index: 4, kind: input, shape index: {}]   ;;  %s2093_s0 = inlined_call_operand.vmem [shape: f32[8,8,1], index: 0, kind: input, shape index: {}]   ;;  %s2094_s2 = inlined_call_operand.vmem [shape: f32[2,8,32], index: 2, kind: input, shape index: {}]   ;;  %s2095_s3 = inlined_call_operand.vmem [shape: f32[1,128], index: 3, kind: input, shape index: {}]   ;;  %s2096_s1 = inlined_call_operand.vmem [shape: f32[2,8,32], index: 1, kind: input, shape index: {}]   ;;  %s2097_s7 = inlined_call_operand.vmem [shape: f32[1,128], index: 7, kind: input, shape index: {}]   ;;  %s2098_s8 = inlined_call_operand.vmem [shape: f32[1,128], index: 8, kind: input, shape index: {}]   ;;  %s2099_s5 = inlined_call_operand.vmem [shape: f32[32,128], index: 5, kind: input, shape index: {}]   ;;  %s2100_s6 = inlined_call_operand.vmem [shape: f32[32,128], index: 6, kind: input, shape index: {}]   ;;  %s2101_s12 = inlined_call_operand.vmem [shape: f32[2,8,32], index: 12, kind: output, shape index: {1}]   ;;  %s2102_s9 = inlined_call_operand.vmem [shape: f32[1,32], index: 9, kind: input, shape index: {}]   ;;  %s2103_s13 = inlined_call_operand.vmem [shape: f32[2,8,32], index: 13, kind: output, shape index: {2}]   ;;  %s2104_s10 = inlined_call_operand.<no memory space> [shape: f32[1,1], index: 10, kind: input, shape index: {}]   ;;  %s2105_s11 = inlined_call_operand.vmem [shape: f32[8,1], index: 11, kind: output, shape index: {0}]  }
   0x1   :  { %v1671_v0 = vld [vmem:[%s2092_s4 + $0x18] sm:$0xff]  ;;  %v1676_v1 = vld [vmem:[%s2092_s4 + $0x10] sm:$0xff]  ;;  %1449 = vset.pattern.permute.xlu0 %v1594_v2  ;;  %1450 = vset.pattern.permute.xlu1 %v1594_v2  ;;  %v49_v3 = vld [vmem:[%s2093_s0] sm:$0xff]  ;;  %s1597_s20 = smov 96  }
   0x2   :  { %85 = vmatpush.msra.mxu0 %v1671_v0  ;;  %189 = vmatpush.msra.mxu2 %v1671_v0  ;;  %v1686_v4 = vld [vmem:[%s2092_s4 + $0x8] sm:$0xff]  ;;  %v44_v5 = vld [vmem:[%s2094_s2] sm:$0xff]  ;;  %v1731_v37 = vld [vmem:[%s2099_s5 + $0x18] sm:$0xff] }
   0x3   :  { %53 = vperm.xlu0 %1449, %v49_v3   ;;  %115 = vrot.lane.b32.xlu1 %v44_v5, %s1595_s18  ;;  %v1696_v6 = vld [vmem:[%s2092_s4] sm:$0xff]  ;;  %v1398_v16 = vld [vmem:[%s2093_s0 + $0x8] sm:$0xff]  ;;  %v1736_v38 = vld [vmem:[%s2099_s5 + $0x10] sm:$0xff] }
   0x4   :  { %86 = vmatpush.msra.mxu0 %v1676_v1  ;;  %190 = vmatpush.msra.mxu2 %v1676_v1  ;;  %v43_v7 = vld [vmem:[%s2096_s1] sm:$0xff]  ;;  %v1741_v39 = vld [vmem:[%s2100_s6 + $0x18] sm:$0xff]  ;;  %v1748_v40 = vld [vmem:[%s2100_s6 + $0x10] sm:$0xff] }
   0x5   :  { %v1710_v8 = vld [vmem:[%s2095_s3] ss:$0 sm:$0xff]  ;;  %160 = vmatpush.msra.mxu1 %v1731_v37  ;;  %v1753_v41 = vld [vmem:[%s2099_s5 + $0x8] sm:$0xff]  ;;  %252 = vmatpush.msra.mxu3 %v1731_v37 }
   0x6   :  { %87 = vmatpush.msra.mxu0 %v1686_v4  ;;  %191 = vmatpush.msra.mxu2 %v1686_v4  ;;  %v1716_v11 = vld [vmem:[%s2097_s7] ss:$0 sm:$0xff]  ;;  %v1758_v42 = vld [vmem:[%s2100_s6 + $0x8] sm:$0xff] }
   0x7   :  { %161 = vmatpush.msra.mxu1 %v1736_v38  ;;  %v1767_v43 = vld [vmem:[%s2099_s5] sm:$0xff]  ;;  %253 = vmatpush.msra.mxu3 %v1736_v38  ;;  %v1393_v47 = vld [vmem:[%s2096_s1 + $0x8] sm:$0xff] }
   0x8   :  { %88 = vmatpush.msra.mxu0 %v1696_v6  ;;  %192 = vmatpush.msra.mxu2 %v1696_v6  ;;  %v1789_v46 = vld [vmem:[%s2100_s6] sm:$0xff]  ;;  %v1394_v61 = vld [vmem:[%s2094_s2 + $0x8] sm:$0xff] }
   0x9   :  { %1395 = vmatmul.msk.f32.vlgmr.msra.gmra.mxu0 %vm69_vm0, %v43_v7  ;;  %162 = vmatpush.msra.mxu1 %v1753_v41  ;;  %v1818_v49 = vld [vmem:[%s2098_s8] ss:$0 sm:$0xff] }
   0xa   :  { %279 = vmatpush.msrb.mxu0 %v1741_v39  ;;  %413 = vmatpush.msrb.mxu2 %v1731_v37 }
   0xb   :  { %254 = vmatpush.msra.mxu3 %v1753_v41  ;;  %163 = vmatpush.msra.mxu1 %v1767_v43 }
   0xc   :  { %280 = vmatpush.msrb.mxu0 %v1748_v40  ;;  %414 = vmatpush.msrb.mxu2 %v1736_v38 }
   0xd   :  { %350 = vmatpush.msrb.mxu1 %v1671_v0  ;;  %255 = vmatpush.msra.mxu3 %v1767_v43 }
   0xe   :  { %281 = vmatpush.msrb.mxu0 %v1758_v42  ;;  %415 = vmatpush.msrb.mxu2 %v1753_v41 }
   0xf   :  { %438 = vmatpush.msrb.mxu3 %v1741_v39  ;;  %351 = vmatpush.msrb.mxu1 %v1676_v1 }
  0x10   :  { %416 = vmatpush.msrb.mxu2 %v1767_v43  ;;  %282 = vmatpush.msrb.mxu0 %v1789_v46 }
  0x11   :  { %439 = vmatpush.msrb.mxu3 %v1748_v40  ;;  %352 = vmatpush.msrb.mxu1 %v1686_v4 }
  0x12   :  { %1402 = vmatmul.msk.f32.vlgmr.msrb.gmra.mxu0 %vm69_vm0, %v1393_v47 }
  0x13   :  { %440 = vmatpush.msrb.mxu3 %v1758_v42  ;;  %353 = vmatpush.msrb.mxu1 %v1696_v6 }
  0x14   :  { %505 = vmatpush.msra.mxu0 %v1671_v0 }
  0x15   :  { %441 = vmatpush.msrb.mxu3 %v1789_v46 }
  0x16   :  { %506 = vmatpush.msra.mxu0 %v1676_v1 }
  0x18   :  { %507 = vmatpush.msra.mxu0 %v1686_v4 }
  0x1a   :  { %508 = vmatpush.msra.mxu0 %v1696_v6 }
  0x1c   :  { %723 = vmatpush.msrb.mxu0 %v1731_v37 }
  0x1e   :  { %724 = vmatpush.msrb.mxu0 %v1736_v38 }
  0x20   :  { %725 = vmatpush.msrb.mxu0 %v1753_v41 }
  0x22   :  { %726 = vmatpush.msrb.mxu0 %v1767_v43 }
  0x75   :  { %v54_v9 = vpop.permute.xlu0 %53  ;;  %v116_v32 = vpop.permute.xlu1 %115 }
  0x76   :  { %v59_v10 = vmul.f32 %v1710_v8, %v54_v9 }
  0x78   :  { %v64_v12 = vadd.f32 %v1716_v11, %v59_v10 }
  0x86   :  { %v90_v13 = vpop.f32.mrf.mxu0 }
  0x87   :  { %v93_v14 = vadd.f32 %v90_v13, %v64_v12 }
  0x89   :  { %1456 = vtanh.f32 %v93_v14  ;;  %v1396_v17 = vmul.f32 -1.442695, %v93_v14 }
  0x8b   :  { %1458 = vpow2.f32 %v1396_v17 }
  0x8f   :  { %v1457_v15 = vpop.eup %1456  ;;  %v284_v52 = vpop.f32.mrf.mxu0 }
  0x90   :  { %120 = vrot.lane.b32.xlu0 %v1457_v15, %s1596_s26 }
  0x91   :  { %v1459_v18 = vpop.eup %1458 }
  0x92   :  { %v97_v19 = vadd.f32 1.0, %v1459_v18 }
  0x94   :  { %1460 = vrcp.f32 %v97_v19  ;;  %v109_v25 = vand.u32 2147483648, %v97_v19  ;;  %vm103_vm2 = vweird.f32 %v97_v19  ;;  %v107_v26 = vand.u32 2147483647, %v97_v19 }
  0x96   :  { %v110_v28 = vor.u32 1.1754944e-38, %v109_v25  ;;  %vm108_vm4 = vcmp.eq.f32.partialorder %v107_v26, 8.507059e+37 }
  0x98   :  { %172 = vperm.xlu0 %1449, %v1398_v16  }
  0x9a   :  { %v1461_v20 = vpop.eup %1460 }
  0x9b   :  { %v99_v21 = vmul.f32 %v1461_v20, %v97_v19  ;;  %vm104_vm1 = vweird.f32 %v1461_v20 }
  0x9c   :  { %vm105_vm3 = vmor %vm103_vm2, %vm104_vm1 }
  0x9d   :  { %v100_v22 = vsub.f32 1.0, %v99_v21 }
  0x9f   :  { %v101_v23 = vmul.f32 %v1461_v20, %v100_v22 }
  0xa1   :  { %v102_v24 = vadd.f32 %v1461_v20, %v101_v23 }
  0xa3   :  { %v106_v27 = vsel %vm105_vm3, %v1461_v20, %v102_v24 }
  0xa4   :  { %v111_v29 = vsel %vm108_vm4, %v110_v28, %v106_v27 }
  0xa5   :  { %v118_v33 = vmul.f32 %v116_v32, %v111_v29 }
 0x102   :  { %v121_v30 = vpop.permute.xlu0 %120 }
 0x103   :  { %v123_v31 = vmul.f32 %v121_v30, %v111_v29 }
 0x105   :  { %125 = vrot.lane.b32.xlu1 %v123_v31, %s1595_s18 }
 0x10a   :  { %v173_v50 = vpop.permute.xlu0 %172 }
 0x10b   :  { %v175_v53 = vmul.f32 %v1710_v8, %v173_v50 }
 0x10d   :  { %v176_v56 = vadd.f32 %v1716_v11, %v175_v53 }
 0x177   :  { %v126_v34 = vpop.permute.xlu1 %125 }
 0x178   :  { %v1724_v35 = vadd.f32 %v126_v34, %v118_v33 }
 0x17a   :  { %1462 = vtanh.f32 %v1724_v35 }
 0x180   :  { %v1463_v36 = vpop.eup %1462 }
 0x181   :  { %131 = vrot.lane.b32.xlu2 %v1463_v36, %s1596_s26 }
 0x1db   :  { %v132_v44 = vpop.permute.xlu2 %131 }
 0x1dc   :  { %v134_v45 = vmul.f32 %v132_v44, %v111_v29 }
 0x1de   :  { %144 = vrot.lane.b32.xlu2 %v134_v45, %s1595_s18 }
 0x238   :  { %v145_v48 = vpop.permute.xlu2 %144 }
 0x239   :  { %1397 = vmatmul.msk.f32.vlgmr.msra.gmra.mxu1 %vm69_vm0, %v145_v48  ;;  %1399 = vmatmul.msk.f32.vlgmr.msra.gmra.mxu2 %vm69_vm0, %v145_v48 }
 0x23a   :  { %593 = vmatpush.msra.mxu2 %v1741_v39  ;;  %568 = vmatpush.msra.mxu1 %v1731_v37 }
 0x23c   :  { %594 = vmatpush.msra.mxu2 %v1748_v40  ;;  %569 = vmatpush.msra.mxu1 %v1736_v38 }
 0x23e   :  { %595 = vmatpush.msra.mxu2 %v1758_v42  ;;  %570 = vmatpush.msra.mxu1 %v1753_v41 }
 0x240   :  { %596 = vmatpush.msra.mxu2 %v1789_v46  ;;  %571 = vmatpush.msra.mxu1 %v1767_v43 }
 0x2b6   :  { %v165_v51 = vpop.f32.mrf.mxu1 }
 0x2b7   :  { %v166_v54 = vadd.f32 %v1818_v49, %v165_v51 }
 0x2b9   :  { %v287_v55 = vadd.f32 %v284_v52, %v166_v54 }
 0x2bb   :  { %1464 = vtanh.f32 %v287_v55  ;;  %v1403_v62 = vmul.f32 -1.442695, %v287_v55 }
 0x2bc   :  { %v194_v57 = vpop.f32.mrf.mxu2 }
 0x2bd   :  { %v197_v58 = vadd.f32 %v194_v57, %v176_v56 }
 0x2bf   :  { %1466 = vtanh.f32 %v197_v58  ;;  %v1400_v7 = vmul.f32 -1.442695, %v197_v58 }
 0x2c0   :  { %1468 = vpow2.f32 %v1403_v62 }
 0x2c1   :  { %v1465_v59 = vpop.eup %1464 }
 0x2c2   :  { %314 = vrot.lane.b32.xlu2 %v1465_v59, %s1596_s26 }
 0x2c5   :  { %v1467_v60 = vpop.eup %1466 }
 0x2c6   :  { %220 = vrot.lane.b32.xlu1 %v1467_v60, %s1596_s26  ;;  %v1469_v63 = vpop.eup %1468 }
 0x2c7   :  { %v291_v2 = vadd.f32 1.0, %v1469_v63 }
 0x2c9   :  { %1470 = vrcp.f32 %v291_v2  ;;  %v303_v14 = vand.u32 2147483648, %v291_v2  ;;  %vm297_vm6 = vweird.f32 %v291_v2  ;;  %v301_v15 = vand.u32 2147483647, %v291_v2 }
 0x2ca   :  { %1472 = vpow2.f32 %v1400_v7 }
 0x2cb   :  { %v304_v18 = vor.u32 1.1754944e-38, %v303_v14  ;;  %vm302_vm8 = vcmp.eq.f32.partialorder %v301_v15, 8.507059e+37 }
 0x2ce   :  { %309 = vrot.lane.b32.xlu1 %v1394_v61, %s1595_s18 }
 0x2cf   :  { %v1471_v3 = vpop.eup %1470 }
 0x2d0   :  { %v293_v5 = vmul.f32 %v1471_v3, %v291_v2  ;;  %v1473_v12 = vpop.eup %1472  ;;  %vm298_vm5 = vweird.f32 %v1471_v3 }
 0x2d1   :  { %v201_v16 = vadd.f32 1.0, %v1473_v12  ;;  %vm299_vm7 = vmor %vm297_vm6, %vm298_vm5 }
 0x2d2   :  { %v294_v9 = vsub.f32 1.0, %v293_v5 }
 0x2d3   :  { %1474 = vrcp.f32 %v201_v16  ;;  %v213_v27 = vand.u32 2147483648, %v201_v16  ;;  %vm207_vm10 = vweird.f32 %v201_v16  ;;  %v211_v28 = vand.u32 2147483647, %v201_v16 }
 0x2d4   :  { %v295_v10 = vmul.f32 %v1471_v3, %v294_v9 }
 0x2d5   :  { %v214_v30 = vor.u32 1.1754944e-38, %v213_v27  ;;  %vm212_vm12 = vcmp.eq.f32.partialorder %v211_v28, 8.507059e+37 }
 0x2d6   :  { %v296_v13 = vadd.f32 %v1471_v3, %v295_v10 }
 0x2d8   :  { %v300_v17 = vsel %vm299_vm7, %v1471_v3, %v296_v13 }
 0x2d9   :  { %v305_v20 = vsel %vm302_vm8, %v304_v18, %v300_v17  ;;  %v1475_v22 = vpop.eup %1474 }
 0x2da   :  { %v203_v23 = vmul.f32 %v1475_v22, %v201_v16  ;;  %vm208_vm9 = vweird.f32 %v1475_v22 }
 0x2db   :  { %vm209_vm11 = vmor %vm207_vm10, %vm208_vm9 }
 0x2dc   :  { %v204_v24 = vsub.f32 1.0, %v203_v23 }
 0x2de   :  { %v205_v25 = vmul.f32 %v1475_v22, %v204_v24 }
 0x2e0   :  { %v206_v26 = vadd.f32 %v1475_v22, %v205_v25 }
 0x2e2   :  { %v210_v29 = vsel %vm209_vm11, %v1475_v22, %v206_v26 }
 0x2e3   :  { %v215_v32 = vsel %vm212_vm12, %v214_v30, %v210_v29 }
 0x2e4   :  { %v218_v48 = vmul.f32 %v215_v32, %v1724_v35  ;;  %v1404_v35 = vld [vmem:[%s2093_s0 + $0x10] sm:$0xff] }
 0x31c   :  { %v315_v19 = vpop.permute.xlu2 %314 }
 0x31d   :  { %v317_v21 = vmul.f32 %v315_v19, %v305_v20 }
 0x31f   :  { %319 = vrot.lane.b32.xlu2 %v317_v21, %s1595_s18 }
 0x338   :  { %v221_v31 = vpop.permute.xlu1 %220 }
 0x339   :  { %v223_v33 = vmul.f32 %v221_v31, %v215_v32 }
 0x33b   :  { %225 = vrot.lane.b32.xlu0 %v223_v33, %s1595_s18 }
 0x340   :  { %v310_v34 = vpop.permute.xlu1 %309 }
 0x341   :  { %v312_v36 = vmul.f32 %v310_v34, %v305_v20 }
 0x379   :  { %v320_v44 = vpop.permute.xlu2 %319 }
 0x37a   :  { %v1831_v45 = vadd.f32 %v320_v44, %v312_v36 }
 0x37c   :  { %1476 = vtanh.f32 %v1831_v45 }
 0x382   :  { %v1477_v47 = vpop.eup %1476 }
 0x383   :  { %325 = vrot.lane.b32.xlu1 %v1477_v47, %s1596_s26 }
 0x38b   :  { %333 = vperm.xlu1 %1450, %v1404_v35  }
 0x3ad   :  { %v226_v50 = vpop.permute.xlu0 %225 }
 0x3ae   :  { %v1836_v51 = vadd.f32 %v226_v50, %v218_v48 }
 0x3b0   :  { %1478 = vtanh.f32 %v1836_v51 }
 0x3b6   :  { %v1479_v52 = vpop.eup %1478 }
 0x3b7   :  { %231 = vrot.lane.b32.xlu0 %v1479_v52, %s1596_s26 }
 0x3f5   :  { %v326_v53 = vpop.permute.xlu1 %325 }
 0x3f6   :  { %v328_v54 = vmul.f32 %v326_v53, %v305_v20 }
 0x3f8   :  { %422 = vrot.lane.b32.xlu0 %v328_v54, %s1595_s18 }
 0x3fd   :  { %v334_v59 = vpop.permute.xlu1 %333 }
 0x3fe   :  { %v336_v60 = vmul.f32 %v1710_v8, %v334_v59 }
 0x400   :  { %v337_v61 = vadd.f32 %v1716_v11, %v336_v60 }
 0x429   :  { %v232_v55 = vpop.permute.xlu0 %231 }
 0x42a   :  { %v234_v56 = vmul.f32 %v232_v55, %v215_v32 }
 0x42c   :  { %236 = vrot.lane.b32.xlu2 %v234_v56, %s1595_s18 }
 0x46a   :  { %v423_v58 = vpop.permute.xlu0 %422 }
 0x486   :  { %v237_v57 = vpop.permute.xlu2 %236 }
 0x487   :  { %1401 = vmatmul.msk.f32.vlgmr.msra.gmra.mxu3 %vm69_vm0, %v237_v57  ;;  %1405 = vmatmul.msk.f32.vlgmr.msrb.gmra.mxu1 %vm69_vm0, %v237_v57 }
 0x488   :  { %660 = vmatpush.msra.mxu3 %v1671_v0  ;;  %748 = vmatpush.msrb.mxu1 %v1741_v39 }
 0x48a   :  { %661 = vmatpush.msra.mxu3 %v1676_v1  ;;  %749 = vmatpush.msrb.mxu1 %v1748_v40 }
 0x48c   :  { %662 = vmatpush.msra.mxu3 %v1686_v4  ;;  %750 = vmatpush.msrb.mxu1 %v1758_v42 }
 0x48e   :  { %663 = vmatpush.msra.mxu3 %v1696_v6  ;;  %751 = vmatpush.msrb.mxu1 %v1789_v46 }
 0x48f   :  { %1408 = vmatmul.msk.f32.vlgmr.msrb.gmra.mxu3 %vm69_vm0, %v423_v58 }
 0x490   :  { %878 = vmatpush.msrb.mxu3 %v1731_v37 }
 0x492   :  { %879 = vmatpush.msrb.mxu3 %v1736_v38 }
 0x494   :  { %880 = vmatpush.msrb.mxu3 %v1753_v41 }
 0x496   :  { %881 = vmatpush.msrb.mxu3 %v1767_v43 }
 0x504   :  { %v355_v62 = vpop.f32.mrf.mxu1 }
 0x505   :  { %v358_v63 = vadd.f32 %v355_v62, %v337_v61 }
 0x507   :  { %1480 = vtanh.f32 %v358_v63  ;;  %v1406_v12 = vmul.f32 -1.442695, %v358_v63 }
 0x50a   :  { %v257_v2 = vpop.f32.mrf.mxu3 }
 0x50b   :  { %v258_v5 = vadd.f32 %v1818_v49, %v257_v2 }
 0x50d   :  { %v1481_v3 = vpop.eup %1480 }
 0x50e   :  { %381 = vrot.lane.b32.xlu2 %v1481_v3, %s1596_s26 }
 0x512   :  { %v443_v7 = vpop.f32.mrf.mxu3 }
 0x513   :  { %v446_v9 = vadd.f32 %v443_v7, %v258_v5 }
 0x515   :  { %1482 = vtanh.f32 %v446_v9  ;;  %v1409_v19 = vmul.f32 -1.442695, %v446_v9 }
 0x516   :  { %1484 = vpow2.f32 %v1406_v12 }
 0x51b   :  { %v1483_v10 = vpop.eup %1482 }
 0x51c   :  { %469 = vrot.lane.b32.xlu0 %v1483_v10, %s1596_s26  ;;  %v1485_v13 = vpop.eup %1484 }
 0x51d   :  { %v362_v14 = vadd.f32 1.0, %v1485_v13 }
 0x51f   :  { %1486 = vrcp.f32 %v362_v14  ;;  %v374_v21 = vand.u32 2147483648, %v362_v14  ;;  %vm368_vm14 = vweird.f32 %v362_v14  ;;  %v372_v22 = vand.u32 2147483647, %v362_v14 }
 0x520   :  { %1488 = vpow2.f32 %v1409_v19 }
 0x521   :  { %v375_v24 = vor.u32 1.1754944e-38, %v374_v21  ;;  %vm373_vm1 = vcmp.eq.f32.partialorder %v372_v22, 8.507059e+37 }
 0x525   :  { %v1487_v15 = vpop.eup %1486 }
 0x526   :  { %v364_v16 = vmul.f32 %v1487_v15, %v362_v14  ;;  %vm369_vm13 = vweird.f32 %v1487_v15  ;;  %v1489_v28 = vpop.eup %1488 }
 0x527   :  { %vm370_vm15 = vmor %vm368_vm14, %vm369_vm13  ;;  %v450_v29 = vadd.f32 1.0, %v1489_v28 }
 0x528   :  { %v365_v17 = vsub.f32 1.0, %v364_v16 }
 0x529   :  { %1490 = vrcp.f32 %v450_v29  ;;  %v462_v36 = vand.u32 2147483648, %v450_v29  ;;  %vm456_vm3 = vweird.f32 %v450_v29  ;;  %v460_v44 = vand.u32 2147483647, %v450_v29 }
 0x52a   :  { %v366_v18 = vmul.f32 %v1487_v15, %v365_v17 }
 0x52b   :  { %v463_v48 = vor.u32 1.1754944e-38, %v462_v36  ;;  %vm461_vm5 = vcmp.eq.f32.partialorder %v460_v44, 8.507059e+37 }
 0x52c   :  { %v367_v20 = vadd.f32 %v1487_v15, %v366_v18 }
 0x52e   :  { %v371_v23 = vsel %vm370_vm15, %v1487_v15, %v367_v20 }
 0x52f   :  { %v376_v26 = vsel %vm373_vm1, %v375_v24, %v371_v23  ;;  %v1491_v30 = vpop.eup %1490 }
 0x530   :  { %v452_v31 = vmul.f32 %v1491_v30, %v450_v29  ;;  %vm457_vm2 = vweird.f32 %v1491_v30  ;;  %v379_v54 = vmul.f32 %v376_v26, %v1836_v51  ;;  %v1410_v51 = vld [vmem:[%s2093_s0 + $0x18] sm:$0xff] }
 0x531   :  { %vm458_vm4 = vmor %vm456_vm3, %vm457_vm2 }
 0x532   :  { %v453_v32 = vsub.f32 1.0, %v452_v31 }
 0x534   :  { %v454_v33 = vmul.f32 %v1491_v30, %v453_v32 }
 0x536   :  { %v455_v34 = vadd.f32 %v1491_v30, %v454_v33 }
 0x538   :  { %v459_v47 = vsel %vm458_vm4, %v1491_v30, %v455_v34 }
 0x539   :  { %v464_v52 = vsel %vm461_vm5, %v463_v48, %v459_v47 }
 0x53a   :  { %v467_v57 = vmul.f32 %v464_v52, %v1831_v45 }
 0x568   :  { %v382_v25 = vpop.permute.xlu2 %381 }
 0x569   :  { %v384_v27 = vmul.f32 %v382_v25, %v376_v26 }
 0x56b   :  { %386 = vrot.lane.b32.xlu1 %v384_v27, %s1595_s18 }
 0x58e   :  { %v470_v50 = vpop.permute.xlu0 %469 }
 0x58f   :  { %v472_v53 = vmul.f32 %v470_v50, %v464_v52 }
 0x591   :  { %474 = vrot.lane.b32.xlu2 %v472_v53, %s1595_s18 }
 0x5dd   :  { %v387_v55 = vpop.permute.xlu1 %386 }
 0x5de   :  { %v1868_v56 = vadd.f32 %v387_v55, %v379_v54 }
 0x5e0   :  { %1492 = vtanh.f32 %v1868_v56 }
 0x5e6   :  { %v1493_v35 = vpop.eup %1492 }
 0x5e7   :  { %392 = vrot.lane.b32.xlu0 %v1493_v35, %s1596_s26 }
 0x5eb   :  { %v475_v58 = vpop.permute.xlu2 %474 }
 0x5ec   :  { %v1873_v59 = vadd.f32 %v475_v58, %v467_v57 }
 0x5ee   :  { %1494 = vtanh.f32 %v1873_v59 }
 0x5f4   :  { %v1495_v60 = vpop.eup %1494 }
 0x5f5   :  { %480 = vrot.lane.b32.xlu1 %v1495_v60, %s1596_s26 }
 0x5fd   :  { %488 = vperm.xlu1 %1450, %v1410_v51  }
 0x659   :  { %v393_v61 = vpop.permute.xlu0 %392 }
 0x65a   :  { %v395_v62 = vmul.f32 %v393_v61, %v376_v26 }
 0x65c   :  { %397 = vrot.lane.b32.xlu2 %v395_v62, %s1595_s18 }
 0x667   :  { %v481_v63 = vpop.permute.xlu1 %480 }
 0x668   :  { %v483_v2 = vmul.f32 %v481_v63, %v464_v52 }
 0x66a   :  { %577 = vrot.lane.b32.xlu0 %v483_v2, %s1595_s18 }
 0x66f   :  { %v489_v5 = vpop.permute.xlu1 %488 }
 0x670   :  { %v491_v7 = vmul.f32 %v1710_v8, %v489_v5 }
 0x672   :  { %v492_v9 = vadd.f32 %v1716_v11, %v491_v7 }
 0x6b6   :  { %v398_v45 = vpop.permute.xlu2 %397 }
 0x6b7   :  { %1407 = vmatmul.msk.f32.vlgmr.msrb.gmra.mxu2 %vm69_vm0, %v398_v45  ;;  %1411 = vmatmul.msk.f32.vlgmr.msra.gmra.mxu0 %vm69_vm0, %v398_v45 }
 0x6b8   :  { %815 = vmatpush.msrb.mxu2 %v1671_v0  ;;  %903 = vmatpush.msra.mxu0 %v1741_v39 }
 0x6ba   :  { %816 = vmatpush.msrb.mxu2 %v1676_v1  ;;  %904 = vmatpush.msra.mxu0 %v1748_v40 }
 0x6bc   :  { %817 = vmatpush.msrb.mxu2 %v1686_v4  ;;  %905 = vmatpush.msra.mxu0 %v1758_v42 }
 0x6be   :  { %818 = vmatpush.msrb.mxu2 %v1696_v6  ;;  %906 = vmatpush.msra.mxu0 %v1789_v46 }
 0x6dc   :  { %v578_v3 = vpop.permute.xlu0 %577 }
 0x6dd   :  { %1414 = vmatmul.msk.f32.vlgmr.msra.gmra.mxu2 %vm69_vm0, %v578_v3 }
 0x6de   :  { %1033 = vmatpush.msra.mxu2 %v1731_v37 }
 0x6e0   :  { %1034 = vmatpush.msra.mxu2 %v1736_v38 }
 0x6e2   :  { %1035 = vmatpush.msra.mxu2 %v1753_v41 }
 0x6e4   :  { %1036 = vmatpush.msra.mxu2 %v1767_v43 }
 0x734   :  { %v510_v10 = vpop.f32.mrf.mxu0 }
 0x735   :  { %v513_v12 = vadd.f32 %v510_v10, %v492_v9 }
 0x737   :  { %1496 = vtanh.f32 %v513_v12  ;;  %v1412_v19 = vmul.f32 -1.442695, %v513_v12 }
 0x73a   :  { %v418_v14 = vpop.f32.mrf.mxu2 }
 0x73b   :  { %v419_v15 = vadd.f32 %v1818_v49, %v418_v14 }
 0x73d   :  { %v1497_v13 = vpop.eup %1496 }
 0x73e   :  { %536 = vrot.lane.b32.xlu2 %v1497_v13, %s1596_s26 }
 0x760   :  { %v598_v16 = vpop.f32.mrf.mxu2 }
 0x761   :  { %v601_v17 = vadd.f32 %v598_v16, %v419_v15 }
 0x763   :  { %1498 = vtanh.f32 %v601_v17  ;;  %v1415_v34 = vmul.f32 -1.442695, %v601_v17 }
 0x764   :  { %1500 = vpow2.f32 %v1412_v19 }
 0x769   :  { %v1499_v18 = vpop.eup %1498 }
 0x76a   :  { %624 = vrot.lane.b32.xlu0 %v1499_v18, %s1596_s26  ;;  %v1501_v20 = vpop.eup %1500 }
 0x76b   :  { %v517_v21 = vadd.f32 1.0, %v1501_v20 }
 0x76d   :  { %1502 = vrcp.f32 %v517_v21  ;;  %v529_v27 = vand.u32 2147483648, %v517_v21  ;;  %vm523_vm7 = vweird.f32 %v517_v21  ;;  %v527_v28 = vand.u32 2147483647, %v517_v21 }
 0x76e   :  { %1504 = vpow2.f32 %v1415_v34 }
 0x76f   :  { %v530_v30 = vor.u32 1.1754944e-38, %v529_v27  ;;  %vm528_vm9 = vcmp.eq.f32.partialorder %v527_v28, 8.507059e+37 }
 0x773   :  { %v1503_v22 = vpop.eup %1502 }
 0x774   :  { %v519_v23 = vmul.f32 %v1503_v22, %v517_v21  ;;  %vm524_vm6 = vweird.f32 %v1503_v22  ;;  %v1505_v36 = vpop.eup %1504 }
 0x775   :  { %vm525_vm8 = vmor %vm523_vm7, %vm524_vm6  ;;  %v605_v44 = vadd.f32 1.0, %v1505_v36 }
 0x776   :  { %v520_v24 = vsub.f32 1.0, %v519_v23 }
 0x777   :  { %1506 = vrcp.f32 %v605_v44  ;;  %v617_v54 = vand.u32 2147483648, %v605_v44  ;;  %vm611_vm11 = vweird.f32 %v605_v44  ;;  %v615_v55 = vand.u32 2147483647, %v605_v44 }
 0x778   :  { %v521_v25 = vmul.f32 %v1503_v22, %v520_v24 }
 0x779   :  { %v618_v57 = vor.u32 1.1754944e-38, %v617_v54  ;;  %vm616_vm13 = vcmp.eq.f32.partialorder %v615_v55, 8.507059e+37 }
 0x77a   :  { %v522_v26 = vadd.f32 %v1503_v22, %v521_v25 }
 0x77c   :  { %v526_v29 = vsel %vm525_vm8, %v1503_v22, %v522_v26 }
 0x77d   :  { %v531_v32 = vsel %vm528_vm9, %v530_v30, %v526_v29  ;;  %v1507_v47 = vpop.eup %1506 }
 0x77e   :  { %v607_v48 = vmul.f32 %v1507_v47, %v605_v44  ;;  %vm612_vm10 = vweird.f32 %v1507_v47  ;;  %v534_v61 = vmul.f32 %v531_v32, %v1868_v56  ;;  %v1416_v56 = vld [vmem:[%s2093_s0 + $0x20] sm:$0xff] }
 0x77f   :  { %vm613_vm12 = vmor %vm611_vm11, %vm612_vm10 }
 0x780   :  { %v608_v50 = vsub.f32 1.0, %v607_v48 }
 0x782   :  { %v609_v52 = vmul.f32 %v1507_v47, %v608_v50 }
 0x784   :  { %v610_v53 = vadd.f32 %v1507_v47, %v609_v52 }
 0x786   :  { %v614_v35 = vsel %vm613_vm12, %v1507_v47, %v610_v53 }
 0x787   :  { %v619_v60 = vsel %vm616_vm13, %v618_v57, %v614_v35 }
 0x788   :  { %v622_v45 = vmul.f32 %v619_v60, %v1873_v59 }
 0x798   :  { %v537_v31 = vpop.permute.xlu2 %536 }
 0x799   :  { %v539_v33 = vmul.f32 %v537_v31, %v531_v32 }
 0x79b   :  { %541 = vrot.lane.b32.xlu1 %v539_v33, %s1595_s18 }
 0x7dc   :  { %v625_v58 = vpop.permute.xlu0 %624 }
 0x7dd   :  { %v627_v51 = vmul.f32 %v625_v58, %v619_v60 }
 0x7df   :  { %629 = vrot.lane.b32.xlu2 %v627_v51, %s1595_s18 }
 0x80d   :  { %v542_v62 = vpop.permute.xlu1 %541 }
 0x80e   :  { %v1905_v63 = vadd.f32 %v542_v62, %v534_v61 }
 0x810   :  { %1508 = vtanh.f32 %v1905_v63 }
 0x816   :  { %v1509_v2 = vpop.eup %1508 }
 0x817   :  { %547 = vrot.lane.b32.xlu0 %v1509_v2, %s1596_s26 }
 0x839   :  { %v630_v3 = vpop.permute.xlu2 %629 }
 0x83a   :  { %v1910_v5 = vadd.f32 %v630_v3, %v622_v45 }
 0x83c   :  { %1510 = vtanh.f32 %v1910_v5 }
 0x842   :  { %v1511_v7 = vpop.eup %1510 }
 0x843   :  { %635 = vrot.lane.b32.xlu1 %v1511_v7, %s1596_s26 }
 0x84b   :  { %643 = vperm.xlu1 %1450, %v1416_v56  }
 0x889   :  { %v548_v9 = vpop.permute.xlu0 %547 }
 0x88a   :  { %v550_v10 = vmul.f32 %v548_v9, %v531_v32 }
 0x88c   :  { %552 = vrot.lane.b32.xlu2 %v550_v10, %s1595_s18 }
 0x8b5   :  { %v636_v12 = vpop.permute.xlu1 %635 }
 0x8b6   :  { %v638_v13 = vmul.f32 %v636_v12, %v619_v60 }
 0x8b8   :  { %732 = vrot.lane.b32.xlu0 %v638_v13, %s1595_s18 }
 0x8bd   :  { %v644_v15 = vpop.permute.xlu1 %643 }
 0x8be   :  { %v646_v16 = vmul.f32 %v1710_v8, %v644_v15 }
 0x8c0   :  { %v647_v17 = vadd.f32 %v1716_v11, %v646_v16 }
 0x8e6   :  { %v553_v59 = vpop.permute.xlu2 %552 }
 0x8e7   :  { %1413 = vmatmul.msk.f32.vlgmr.msra.gmra.mxu1 %vm69_vm0, %v553_v59  ;;  %1417 = vmatmul.msk.f32.vlgmr.msra.gmra.mxu3 %vm69_vm0, %v553_v59 }
 0x8e8   :  { %970 = vmatpush.msra.mxu1 %v1671_v0  ;;  %1058 = vmatpush.msra.mxu3 %v1741_v39 }
 0x8ea   :  { %971 = vmatpush.msra.mxu1 %v1676_v1  ;;  %1059 = vmatpush.msra.mxu3 %v1748_v40 }
 0x8ec   :  { %972 = vmatpush.msra.mxu1 %v1686_v4  ;;  %1060 = vmatpush.msra.mxu3 %v1758_v42 }
 0x8ee   :  { %973 = vmatpush.msra.mxu1 %v1696_v6  ;;  %1061 = vmatpush.msra.mxu3 %v1789_v46 }
 0x92a   :  { %v733_v14 = vpop.permute.xlu0 %732 }
 0x92b   :  { %1420 = vmatmul.msk.f32.vlgmr.msrb.gmra.mxu1 %vm69_vm0, %v733_v14 }
 0x92c   :  { %1188 = vmatpush.msrb.mxu1 %v1731_v37 }
 0x92e   :  { %1189 = vmatpush.msrb.mxu1 %v1736_v38 }
 0x930   :  { %1190 = vmatpush.msrb.mxu1 %v1753_v41 }
 0x932   :  { %1191 = vmatpush.msrb.mxu1 %v1767_v43 }
 0x964   :  { %v573_v21 = vpop.f32.mrf.mxu1 }
 0x965   :  { %v574_v37 = vadd.f32 %v1818_v49, %v573_v21 }
 0x96a   :  { %v665_v18 = vpop.f32.mrf.mxu3 }
 0x96b   :  { %v668_v19 = vadd.f32 %v665_v18, %v647_v17 }
 0x96d   :  { %1512 = vtanh.f32 %v668_v19  ;;  %v1418_v22 = vmul.f32 -1.442695, %v668_v19 }
 0x96f   :  { %1514 = vpow2.f32 %v1418_v22 }
 0x973   :  { %v1513_v20 = vpop.eup %1512 }
 0x974   :  { %691 = vrot.lane.b32.xlu2 %v1513_v20, %s1596_s26 }
 0x975   :  { %v1515_v23 = vpop.eup %1514 }
 0x976   :  { %v672_v43 = vadd.f32 1.0, %v1515_v23 }
 0x978   :  { %v684_v30 = vand.u32 2147483648, %v672_v43  ;;  %vm678_vm15 = vweird.f32 %v672_v43  ;;  %v682_v31 = vand.u32 2147483647, %v672_v43 }
 0x97a   :  { %v685_v33 = vor.u32 1.1754944e-38, %v684_v30  ;;  %vm683_vm2 = vcmp.eq.f32.partialorder %v682_v31, 8.507059e+37 }
 0x9a8   :  { %v753_v38 = vpop.f32.mrf.mxu1 }
 0x9a9   :  { %v756_v41 = vadd.f32 %v753_v38, %v574_v37 }
 0x9ab   :  { %1516 = vtanh.f32 %v756_v41  ;;  %v1421_v47 = vmul.f32 -1.442695, %v756_v41 }
 0x9ac   :  { %1518 = vrcp.f32 %v672_v43 }
 0x9ad   :  { %1520 = vpow2.f32 %v1421_v47 }
 0x9b1   :  { %v1517_v24 = vpop.eup %1516 }
 0x9b2   :  { %779 = vrot.lane.b32.xlu0 %v1517_v24, %s1596_s26  ;;  %v1519_v25 = vpop.eup %1518 }
 0x9b3   :  { %v674_v26 = vmul.f32 %v1519_v25, %v672_v43  ;;  %vm679_vm14 = vweird.f32 %v1519_v25  ;;  %v1521_v48 = vpop.eup %1520 }
 0x9b4   :  { %vm680_vm1 = vmor %vm678_vm15, %vm679_vm14  ;;  %v760_v50 = vadd.f32 1.0, %v1521_v48 }
 0x9b5   :  { %v675_v27 = vsub.f32 1.0, %v674_v26 }
 0x9b6   :  { %1522 = vrcp.f32 %v760_v50  ;;  %v772_v57 = vand.u32 2147483648, %v760_v50  ;;  %vm766_vm4 = vweird.f32 %v760_v50  ;;  %v770_v58 = vand.u32 2147483647, %v760_v50 }
 0x9b7   :  { %v676_v28 = vmul.f32 %v1519_v25, %v675_v27 }
 0x9b8   :  { %v773_v51 = vor.u32 1.1754944e-38, %v772_v57  ;;  %vm771_vm6 = vcmp.eq.f32.partialorder %v770_v58, 8.507059e+37 }
 0x9b9   :  { %v677_v29 = vadd.f32 %v1519_v25, %v676_v28 }
 0x9bb   :  { %v681_v32 = vsel %vm680_vm1, %v1519_v25, %v677_v29 }
 0x9bc   :  { %v686_v36 = vsel %vm683_vm2, %v685_v33, %v681_v32  ;;  %v1523_v52 = vpop.eup %1522 }
 0x9bd   :  { %v762_v53 = vmul.f32 %v1523_v52, %v760_v50  ;;  %vm767_vm3 = vweird.f32 %v1523_v52  ;;  %v689_v45 = vmul.f32 %v686_v36, %v1905_v63  ;;  %v1422_v63 = vld [vmem:[%s2093_s0 + $0x28] sm:$0xff] }
 0x9be   :  { %vm768_vm5 = vmor %vm766_vm4, %vm767_vm3 }
 0x9bf   :  { %v763_v54 = vsub.f32 1.0, %v762_v53 }
 0x9c1   :  { %v764_v55 = vmul.f32 %v1523_v52, %v763_v54 }
 0x9c3   :  { %v765_v35 = vadd.f32 %v1523_v52, %v764_v55 }
 0x9c5   :  { %v769_v60 = vsel %vm768_vm5, %v1523_v52, %v765_v35 }
 0x9c6   :  { %v774_v62 = vsel %vm771_vm6, %v773_v51, %v769_v60 }
 0x9c7   :  { %v777_v9 = vmul.f32 %v774_v62, %v1910_v5 }
 0x9ce   :  { %v692_v34 = vpop.permute.xlu2 %691 }
 0x9cf   :  { %v694_v44 = vmul.f32 %v692_v34, %v686_v36 }
 0x9d1   :  { %696 = vrot.lane.b32.xlu1 %v694_v44, %s1595_s18 }
 0xa24   :  { %v780_v61 = vpop.permute.xlu0 %779 }
 0xa25   :  { %v782_v2 = vmul.f32 %v780_v61, %v774_v62 }
 0xa27   :  { %784 = vrot.lane.b32.xlu2 %v782_v2, %s1595_s18 }
 0xa43   :  { %v697_v3 = vpop.permute.xlu1 %696 }
 0xa44   :  { %v1942_v7 = vadd.f32 %v697_v3, %v689_v45 }
 0xa46   :  { %1524 = vtanh.f32 %v1942_v7 }
 0xa4c   :  { %v1525_v56 = vpop.eup %1524 }
 0xa4d   :  { %702 = vrot.lane.b32.xlu0 %v1525_v56, %s1596_s26 }
 0xa81   :  { %v785_v10 = vpop.permute.xlu2 %784 }
 0xa82   :  { %v1947_v12 = vadd.f32 %v785_v10, %v777_v9 }
 0xa84   :  { %1526 = vtanh.f32 %v1947_v12 }
 0xa8a   :  { %v1527_v13 = vpop.eup %1526 }
 0xa8b   :  { %790 = vrot.lane.b32.xlu1 %v1527_v13, %s1596_s26 }
 0xa93   :  { %798 = vperm.xlu1 %1450, %v1422_v63   ;;  %v1588_v63 = vld [vmem:[%s2100_s6 + $0x18] sm:$0xff] }
 0xabf   :  { %v703_v59 = vpop.permute.xlu0 %702 }
 0xac0   :  { %v705_v14 = vmul.f32 %v703_v59, %v686_v36  ;;  %v1589_v59 = vld [vmem:[%s2100_s6 + $0x10] sm:$0xff] }
 0xac2   :  { %707 = vrot.lane.b32.xlu2 %v705_v14, %s1595_s18  ;;  %v1590_v14 = vld [vmem:[%s2100_s6 + $0x8] sm:$0xff] }
 0xafd   :  { %v791_v15 = vpop.permute.xlu1 %790 }
 0xafe   :  { %v793_v16 = vmul.f32 %v791_v15, %v774_v62 }
 0xb00   :  { %887 = vrot.lane.b32.xlu0 %v793_v16, %s1595_s18 }
 0xb05   :  { %v799_v18 = vpop.permute.xlu1 %798 }
 0xb1c   :  { %v708_v5 = vpop.permute.xlu2 %707 }
 0xb1d   :  { %1419 = vmatmul.msk.f32.vlgmr.msrb.gmra.mxu0 %vm69_vm0, %v708_v5  ;;  %1423 = vmatmul.msk.f32.vlgmr.msrb.gmra.mxu2 %vm69_vm0, %v708_v5  ;;  %v2005_v5 = vld [vmem:[%s2095_s3] ss:$0 sm:$0xff] }
 0xb1e   :  { %1125 = vmatpush.msrb.mxu0 %v1671_v0  ;;  %1213 = vmatpush.msrb.mxu2 %v1741_v39  ;;  %v801_v0 = vmul.f32 %v1710_v8, %v799_v18  ;;  %v2011_v18 = vld [vmem:[%s2097_s7] ss:$0 sm:$0xff] }
 0xb20   :  { %1126 = vmatpush.msrb.mxu0 %v1676_v1  ;;  %1214 = vmatpush.msrb.mxu2 %v1748_v40  ;;  %v802_v39 = vadd.f32 %v1716_v11, %v801_v0 }
 0xb22   :  { %1127 = vmatpush.msrb.mxu0 %v1686_v4  ;;  %1215 = vmatpush.msrb.mxu2 %v1758_v42 }
 0xb24   :  { %1128 = vmatpush.msrb.mxu0 %v1696_v6  ;;  %1216 = vmatpush.msrb.mxu2 %v1789_v46 }
 0xb72   :  { %v888_v17 = vpop.permute.xlu0 %887 }
 0xb73   :  { %1426 = vmatmul.msk.f32.vlgmr.msra.gmra.mxu0 %vm69_vm0, %v888_v17 }
 0xb9a   :  { %v728_v20 = vpop.f32.mrf.mxu0 }
 0xb9b   :  { %v729_v22 = vadd.f32 %v1818_v49, %v728_v20 }
 0xba0   :  { %v820_v19 = vpop.f32.mrf.mxu2 }
 0xba1   :  { %v823_v1 = vadd.f32 %v820_v19, %v802_v39 }
 0xba3   :  { %1528 = vtanh.f32 %v823_v1  ;;  %v1424_v4 = vmul.f32 -1.442695, %v823_v1 }
 0xba5   :  { %1530 = vpow2.f32 %v1424_v4 }
 0xba9   :  { %v1529_v40 = vpop.eup %1528 }
 0xbaa   :  { %846 = vrot.lane.b32.xlu2 %v1529_v40, %s1596_s26 }
 0xbab   :  { %v1531_v42 = vpop.eup %1530 }
 0xbac   :  { %v827_v6 = vadd.f32 1.0, %v1531_v42 }
 0xbae   :  { %1532 = vrcp.f32 %v827_v6  ;;  %v839_v24 = vand.u32 2147483648, %v827_v6  ;;  %vm833_vm8 = vweird.f32 %v827_v6  ;;  %v837_v25 = vand.u32 2147483647, %v827_v6 }
 0xbb0   :  { %v840_v27 = vor.u32 1.1754944e-38, %v839_v24  ;;  %vm838_vm10 = vcmp.eq.f32.partialorder %v837_v25, 8.507059e+37 }
 0xbb4   :  { %v1533_v21 = vpop.eup %1532 }
 0xbb5   :  { %v829_v8 = vmul.f32 %v1533_v21, %v827_v6  ;;  %vm834_vm7 = vweird.f32 %v1533_v21 }
 0xbb6   :  { %vm835_vm9 = vmor %vm833_vm8, %vm834_vm7 }
 0xbb7   :  { %v830_v11 = vsub.f32 1.0, %v829_v8 }
 0xbb9   :  { %v831_v23 = vmul.f32 %v1533_v21, %v830_v11 }
 0xbbb   :  { %v832_v43 = vadd.f32 %v1533_v21, %v831_v23 }
 0xbbd   :  { %v836_v26 = vsel %vm835_vm9, %v1533_v21, %v832_v43 }
 0xbbe   :  { %v841_v29 = vsel %vm838_vm10, %v840_v27, %v836_v26 }
 0xbbf   :  { %v844_v58 = vmul.f32 %v841_v29, %v1942_v7  ;;  %v1428_v7 = vld [vmem:[%s2093_s0 + $0x30] sm:$0xff] }
 0xbf0   :  { %v908_v37 = vpop.f32.mrf.mxu0 }
 0xbf1   :  { %v911_v38 = vadd.f32 %v908_v37, %v729_v22 }
 0xbf3   :  { %1534 = vtanh.f32 %v911_v38  ;;  %v1427_v31 = vmul.f32 -1.442695, %v911_v38 }
 0xbf5   :  { %1536 = vpow2.f32 %v1427_v31 }
 0xbf9   :  { %v1535_v41 = vpop.eup %1534 }
 0xbfa   :  { %934 = vrot.lane.b32.xlu0 %v1535_v41, %s1596_s26 }
 0xbfb   :  { %v1537_v32 = vpop.eup %1536 }
 0xbfc   :  { %v915_v33 = vadd.f32 1.0, %v1537_v32 }
 0xbfe   :  { %1538 = vrcp.f32 %v915_v33  ;;  %v927_v50 = vand.u32 2147483648, %v915_v33  ;;  %vm921_vm12 = vweird.f32 %v915_v33  ;;  %v925_v52 = vand.u32 2147483647, %v915_v33 }
 0xc00   :  { %v928_v54 = vor.u32 1.1754944e-38, %v927_v50  ;;  %vm926_vm14 = vcmp.eq.f32.partialorder %v925_v52, 8.507059e+37 }
 0xc04   :  { %v847_v28 = vpop.permute.xlu2 %846  ;;  %v1539_v34 = vpop.eup %1538 }
 0xc05   :  { %v849_v30 = vmul.f32 %v847_v28, %v841_v29  ;;  %v917_v36 = vmul.f32 %v1539_v34, %v915_v33  ;;  %vm922_vm11 = vweird.f32 %v1539_v34 }
 0xc06   :  { %vm923_vm13 = vmor %vm921_vm12, %vm922_vm11 }
 0xc07   :  { %851 = vrot.lane.b32.xlu1 %v849_v30, %s1595_s18  ;;  %v918_v44 = vsub.f32 1.0, %v917_v36 }
 0xc09   :  { %v919_v47 = vmul.f32 %v1539_v34, %v918_v44 }
 0xc0b   :  { %v920_v48 = vadd.f32 %v1539_v34, %v919_v47 }
 0xc0d   :  { %v924_v53 = vsel %vm923_vm13, %v1539_v34, %v920_v48 }
 0xc0e   :  { %v929_v35 = vsel %vm926_vm14, %v928_v54, %v924_v53 }
 0xc0f   :  { %v932_v62 = vmul.f32 %v929_v35, %v1947_v12 }
 0xc6c   :  { %v935_v55 = vpop.permute.xlu0 %934 }
 0xc6d   :  { %v937_v57 = vmul.f32 %v935_v55, %v929_v35 }
 0xc6f   :  { %939 = vrot.lane.b32.xlu2 %v937_v57, %s1595_s18 }
 0xc79   :  { %v852_v60 = vpop.permute.xlu1 %851 }
 0xc7a   :  { %v1975_v51 = vadd.f32 %v852_v60, %v844_v58 }
 0xc7c   :  { %1540 = vtanh.f32 %v1975_v51 }
 0xc82   :  { %v1541_v61 = vpop.eup %1540 }
 0xc83   :  { %857 = vrot.lane.b32.xlu0 %v1541_v61, %s1596_s26 }
 0xcc9   :  { %v940_v2 = vpop.permute.xlu2 %939 }
 0xcca   :  { %v1980_v45 = vadd.f32 %v940_v2, %v932_v62 }
 0xccc   :  { %1542 = vtanh.f32 %v1980_v45 }
 0xcd2   :  { %v1543_v3 = vpop.eup %1542 }
 0xcd3   :  { %945 = vrot.lane.b32.xlu1 %v1543_v3, %s1596_s26 }
 0xcdb   :  { %953 = vperm.xlu1 %1450, %v1428_v7   ;;  %v1434_v7 = vld [vmem:[%s2093_s0 + $0x38] sm:$0xff] }
 0xcf5   :  { %v858_v56 = vpop.permute.xlu0 %857 }
 0xcf6   :  { %v860_v9 = vmul.f32 %v858_v56, %v841_v29 }
 0xcf8   :  { %862 = vrot.lane.b32.xlu2 %v860_v9, %s1595_s18 }
 0xd45   :  { %v946_v10 = vpop.permute.xlu1 %945 }
 0xd46   :  { %v948_v13 = vmul.f32 %v946_v10, %v929_v35 }
 0xd48   :  { %1042 = vrot.lane.b32.xlu0 %v948_v13, %s1595_s18 }
 0xd4d   :  { %v954_v16 = vpop.permute.xlu1 %953 }
 0xd4e   :  { %v956_v17 = vmul.f32 %v2005_v5, %v954_v16 }
 0xd50   :  { %v957_v0 = vadd.f32 %v2011_v18, %v956_v17 }
 0xd52   :  { %v863_v12 = vpop.permute.xlu2 %862 }
 0xd53   :  { %1425 = vmatmul.msk.f32.vlgmr.msrb.gmra.mxu3 %vm69_vm0, %v863_v12  ;;  %1429 = vmatmul.msk.f32.vlgmr.msra.gmra.mxu1 %vm69_vm0, %v863_v12 }
 0xd54   :  { %1276 = vmatpush.msrb.mxu3 %v1588_v63 }
 0xd56   :  { %1277 = vmatpush.msrb.mxu3 %v1589_v59 }
 0xd58   :  { %1278 = vmatpush.msrb.mxu3 %v1590_v14 }
 0xd5a   :  { %1279 = vmatpush.msrb.mxu3 %v1789_v46 }
 0xdba   :  { %v1043_v15 = vpop.permute.xlu0 %1042 }
 0xdbb   :  { %1432 = vmatmul.msk.f32.vlgmr.msra.gmra.mxu3 %vm69_vm0, %v1043_v15 }
 0xdd0   :  { %v975_v39 = vpop.f32.mrf.mxu1 }
 0xdd1   :  { %v978_v46 = vadd.f32 %v975_v39, %v957_v0 }
 0xdd3   :  { %1544 = vtanh.f32 %v978_v46  ;;  %v1430_v1 = vmul.f32 -1.442695, %v978_v46 }
 0xdd5   :  { %1546 = vpow2.f32 %v1430_v1 }
 0xdd6   :  { %v883_v24 = vpop.f32.mrf.mxu3 }
 0xdd7   :  { %v884_v25 = vadd.f32 %v1818_v49, %v883_v24 }
 0xdd9   :  { %v1545_v19 = vpop.eup %1544 }
 0xdda   :  { %1001 = vrot.lane.b32.xlu2 %v1545_v19, %s1596_s26 }
 0xddb   :  { %v1547_v40 = vpop.eup %1546 }
 0xddc   :  { %v982_v4 = vadd.f32 1.0, %v1547_v40 }
 0xdde   :  { %1548 = vrcp.f32 %v982_v4  ;;  %v994_v37 = vand.u32 2147483648, %v982_v4  ;;  %vm988_vm1 = vweird.f32 %v982_v4  ;;  %v992_v38 = vand.u32 2147483647, %v982_v4 }
 0xde0   :  { %v995_v11 = vor.u32 1.1754944e-38, %v994_v37  ;;  %vm993_vm3 = vcmp.eq.f32.partialorder %v992_v38, 8.507059e+37 }
 0xde4   :  { %v1549_v42 = vpop.eup %1548 }
 0xde5   :  { %v984_v6 = vmul.f32 %v1549_v42, %v982_v4  ;;  %vm989_vm15 = vweird.f32 %v1549_v42 }
 0xde6   :  { %vm990_vm2 = vmor %vm988_vm1, %vm989_vm15 }
 0xde7   :  { %v985_v20 = vsub.f32 1.0, %v984_v6 }
 0xde9   :  { %v986_v21 = vmul.f32 %v1549_v42, %v985_v20 }
 0xdeb   :  { %v987_v22 = vadd.f32 %v1549_v42, %v986_v21 }
 0xded   :  { %v991_v8 = vsel %vm990_vm2, %v1549_v42, %v987_v22 }
 0xdee   :  { %v996_v23 = vsel %vm993_vm3, %v995_v11, %v991_v8 }
 0xdef   :  { %v999_v34 = vmul.f32 %v996_v23, %v1975_v51 }
 0xe34   :  { %v1002_v41 = vpop.permute.xlu2 %1001 }
 0xe35   :  { %v1004_v43 = vmul.f32 %v1002_v41, %v996_v23 }
 0xe37   :  { %1006 = vrot.lane.b32.xlu1 %v1004_v43, %s1595_s18 }
 0xe3e   :  { %v1063_v26 = vpop.f32.mrf.mxu3 }
 0xe3f   :  { %v1066_v27 = vadd.f32 %v1063_v26, %v884_v25 }
 0xe41   :  { %1550 = vtanh.f32 %v1066_v27  ;;  %v1433_v29 = vmul.f32 -1.442695, %v1066_v27 }
 0xe43   :  { %1552 = vpow2.f32 %v1433_v29 }
 0xe47   :  { %v1551_v28 = vpop.eup %1550 }
 0xe48   :  { %1089 = vrot.lane.b32.xlu0 %v1551_v28, %s1596_s26 }
 0xe49   :  { %v1553_v30 = vpop.eup %1552 }
 0xe4a   :  { %v1070_v31 = vadd.f32 1.0, %v1553_v30 }
 0xe4c   :  { %1554 = vrcp.f32 %v1070_v31  ;;  %v1082_v52 = vand.u32 2147483648, %v1070_v31  ;;  %vm1076_vm5 = vweird.f32 %v1070_v31  ;;  %v1080_v53 = vand.u32 2147483647, %v1070_v31 }
 0xe4e   :  { %v1083_v55 = vor.u32 1.1754944e-38, %v1082_v52  ;;  %vm1081_vm7 = vcmp.eq.f32.partialorder %v1080_v53, 8.507059e+37 }
 0xe52   :  { %v1555_v32 = vpop.eup %1554 }
 0xe53   :  { %v1072_v33 = vmul.f32 %v1555_v32, %v1070_v31  ;;  %vm1077_vm4 = vweird.f32 %v1555_v32 }
 0xe54   :  { %vm1078_vm6 = vmor %vm1076_vm5, %vm1077_vm4 }
 0xe55   :  { %v1073_v47 = vsub.f32 1.0, %v1072_v33 }
 0xe57   :  { %v1074_v49 = vmul.f32 %v1555_v32, %v1073_v47 }
 0xe59   :  { %v1075_v50 = vadd.f32 %v1555_v32, %v1074_v49 }
 0xe5b   :  { %v1079_v54 = vsel %vm1078_vm6, %v1555_v32, %v1075_v50 }
 0xe5c   :  { %v1084_v57 = vsel %vm1081_vm7, %v1083_v55, %v1079_v54  ;;  %vm1379_vm7 = vcmask 7168  }
 0xe5d   :  { %v1087_v60 = vmul.f32 %v1084_v57, %v1980_v45 }
 0xea9   :  { %v1007_v36 = vpop.permute.xlu1 %1006 }
 0xeaa   :  { %v2019_v44 = vadd.f32 %v1007_v36, %v999_v34 }
 0xeac   :  { %1556 = vtanh.f32 %v2019_v44 }
 0xeb2   :  { %v1557_v48 = vpop.eup %1556 }
 0xeb3   :  { %1012 = vrot.lane.b32.xlu0 %v1557_v48, %s1596_s26 }
 0xeba   :  { %v1090_v35 = vpop.permute.xlu0 %1089 }
 0xebb   :  { %v1092_v58 = vmul.f32 %v1090_v35, %v1084_v57 }
 0xebd   :  { %1094 = vrot.lane.b32.xlu2 %v1092_v58, %s1595_s18 }
 0xf17   :  { %v1095_v51 = vpop.permute.xlu2 %1094 }
 0xf18   :  { %v2025_v61 = vadd.f32 %v1095_v51, %v1087_v60 }
 0xf1a   :  { %1558 = vtanh.f32 %v2025_v61 }
 0xf20   :  { %v1559_v62 = vpop.eup %1558 }
 0xf21   :  { %1100 = vrot.lane.b32.xlu1 %v1559_v62, %s1596_s26 }
 0xf25   :  { %v1013_v2 = vpop.permute.xlu0 %1012 }
 0xf26   :  { %v1015_v3 = vmul.f32 %v1013_v2, %v996_v23 }
 0xf28   :  { %1017 = vrot.lane.b32.xlu2 %v1015_v3, %s1595_s18 }
 0xf29   :  { %1108 = vperm.xlu1 %1450, %v1434_v7  }
 0xf82   :  { %v1018_v56 = vpop.permute.xlu2 %1017 }
 0xf83   :  { %1431 = vmatmul.msk.f32.vlgmr.msra.gmra.mxu2 %vm69_vm0, %v1018_v56  ;;  %1435 = vmatmul.msk.f32.vlgmr.msrb.gmra.mxu0 %vm69_vm0, %v1018_v56 }
 0xf93   :  { %v1101_v45 = vpop.permute.xlu1 %1100 }
 0xf94   :  { %v1103_v9 = vmul.f32 %v1101_v45, %v1084_v57  ;;  %v1454_v45 = vld [vmem:[%s2102_s9] ss:$0 sm:$0xff] }
 0xf96   :  { %1197 = vrot.lane.b32.xlu0 %v1103_v9, %s1595_s18 }
 0xf9b   :  { %v1109_v10 = vpop.permute.xlu1 %1108 }
 0xf9c   :  { %v1111_v13 = vmul.f32 %v2005_v5, %v1109_v10  ;;  %v2043_v5 = vld [vmem:[%s2098_s8] ss:$0 sm:$0xff] }
 0xf9e   :  { %v1112_v12 = vadd.f32 %v2011_v18, %v1111_v13 }
0x1000   :  { %v1130_v63 = vpop.f32.mrf.mxu0 }
0x1001   :  { %v1133_v59 = vadd.f32 %v1130_v63, %v1112_v12 }
0x1003   :  { %1560 = vtanh.f32 %v1133_v59  ;;  %v1436_v16 = vmul.f32 -1.442695, %v1133_v59 }
0x1005   :  { %1562 = vpow2.f32 %v1436_v16 }
0x1006   :  { %v1038_v39 = vpop.f32.mrf.mxu2 }
0x1007   :  { %v1039_v18 = vadd.f32 %v2043_v5, %v1038_v39 }
0x1008   :  { %v1198_v14 = vpop.permute.xlu0 %1197 }
0x1009   :  { %v1561_v15 = vpop.eup %1560  ;;  %1438 = vmatmul.msk.f32.vlgmr.msrb.gmra.mxu2 %vm69_vm0, %v1198_v14 }
0x100a   :  { %1156 = vrot.lane.b32.xlu0 %v1561_v15, %s1596_s26 }
0x100b   :  { %v1563_v17 = vpop.eup %1562 }
0x100c   :  { %v1137_v0 = vadd.f32 1.0, %v1563_v17 }
0x100e   :  { %1564 = vrcp.f32 %v1137_v0  ;;  %v1149_v21 = vand.u32 2147483648, %v1137_v0  ;;  %vm1143_vm9 = vweird.f32 %v1137_v0  ;;  %v1147_v22 = vand.u32 2147483647, %v1137_v0 }
0x1010   :  { %v1150_v38 = vor.u32 1.1754944e-38, %v1149_v21  ;;  %vm1148_vm11 = vcmp.eq.f32.partialorder %v1147_v22, 8.507059e+37 }
0x1014   :  { %v1565_v46 = vpop.eup %1564 }
0x1015   :  { %v1139_v19 = vmul.f32 %v1565_v46, %v1137_v0  ;;  %vm1144_vm8 = vweird.f32 %v1565_v46 }
0x1016   :  { %vm1145_vm10 = vmor %vm1143_vm9, %vm1144_vm8 }
0x1017   :  { %v1140_v1 = vsub.f32 1.0, %v1139_v19 }
0x1019   :  { %v1141_v42 = vmul.f32 %v1565_v46, %v1140_v1 }
0x101b   :  { %v1142_v6 = vadd.f32 %v1565_v46, %v1141_v42 }
0x101d   :  { %v1146_v37 = vsel %vm1145_vm10, %v1565_v46, %v1142_v6 }
0x101e   :  { %v1151_v11 = vsel %vm1148_vm11, %v1150_v38, %v1146_v37  ;;  %v19_v38 = vstv %s2104_s10 }
0x101f   :  { %v1154_v49 = vmul.f32 %v1151_v11, %v2019_v44  ;;  %20 = vst [vmem:[#allocation2] sm:$0x1] %v19_v38 }
0x107c   :  { %v1157_v8 = vpop.permute.xlu0 %1156 }
0x107d   :  { %v1159_v41 = vmul.f32 %v1157_v8, %v1151_v11 }
0x108c   :  { %v1218_v40 = vpop.f32.mrf.mxu2 }
0x108d   :  { %v1221_v4 = vadd.f32 %v1218_v40, %v1039_v18 }
0x108f   :  { %1566 = vtanh.f32 %v1221_v4  ;;  %v1439_v23 = vmul.f32 -1.442695, %v1221_v4 }
0x1091   :  { %1568 = vpow2.f32 %v1439_v23  ;;  %v1455_v23 = vld [vmem:[#allocation2] ss:$0 sm:$0xff] }
0x1095   :  { %v1567_v20 = vpop.eup %1566 }
0x1096   :  { %1244 = vrot.lane.b32.xlu2 %v1567_v20, %s1596_s26 }
0x1097   :  { %v1569_v43 = vpop.eup %1568 }
0x1098   :  { %v1225_v24 = vadd.f32 1.0, %v1569_v43 }
0x109a   :  { %1570 = vrcp.f32 %v1225_v24  ;;  %v1237_v30 = vand.u32 2147483648, %v1225_v24  ;;  %vm1231_vm13 = vweird.f32 %v1225_v24  ;;  %v1235_v31 = vand.u32 2147483647, %v1225_v24 }
0x109c   :  { %v1238_v33 = vor.u32 1.1754944e-38, %v1237_v30  ;;  %vm1236_vm15 = vcmp.eq.f32.partialorder %v1235_v31, 8.507059e+37 }
0x109e   :  { %1161 = vrot.lane.b32.xlu2 %v1159_v41, %s1595_s18 }
0x10a0   :  { %v1571_v25 = vpop.eup %1570 }
0x10a1   :  { %v1227_v26 = vmul.f32 %v1571_v25, %v1225_v24  ;;  %vm1232_vm12 = vweird.f32 %v1571_v25 }
0x10a2   :  { %vm1233_vm14 = vmor %vm1231_vm13, %vm1232_vm12 }
0x10a3   :  { %v1228_v27 = vsub.f32 1.0, %v1227_v26 }
0x10a5   :  { %v1229_v28 = vmul.f32 %v1571_v25, %v1228_v27 }
0x10a7   :  { %v1230_v29 = vadd.f32 %v1571_v25, %v1229_v28 }
0x10a9   :  { %v1234_v32 = vsel %vm1233_vm14, %v1571_v25, %v1230_v29 }
0x10aa   :  { %v1239_v36 = vsel %vm1236_vm15, %v1238_v33, %v1234_v32 }
0x10ab   :  { %v1242_v53 = vmul.f32 %v1239_v36, %v2025_v61 }
0x10f0   :  { %v1245_v34 = vpop.permute.xlu2 %1244 }
0x10f1   :  { %v1247_v47 = vmul.f32 %v1245_v34, %v1239_v36 }
0x10f3   :  { %1249 = vrot.lane.b32.xlu1 %v1247_v47, %s1595_s18 }
0x10f8   :  { %v1162_v48 = vpop.permute.xlu2 %1161 }
0x10f9   :  { %v1164_v50 = vadd.f32 %v1162_v48, %v1154_v49 }
0x10fb   :  { %1572 = vtanh.f32 %v1164_v50 }
0x1101   :  { %v1573_v52 = vpop.eup %1572 }
0x1102   :  { %1167 = vrot.lane.b32.xlu1 %v1573_v52, %s1596_s26 }
0x1165   :  { %v1250_v54 = vpop.permute.xlu1 %1249 }
0x1166   :  { %v1252_v55 = vadd.f32 %v1250_v54, %v1242_v53 }
0x1168   :  { %1574 = vtanh.f32 %v1252_v55 }
0x116e   :  { %v1575_v35 = vpop.eup %1574 }
0x116f   :  { %1255 = vrot.lane.b32.xlu0 %v1575_v35, %s1596_s26 }
0x1174   :  { %v1168_v57 = vpop.permute.xlu1 %1167 }
0x1175   :  { %v1170_v58 = vmul.f32 %v1168_v57, %v1151_v11 }
0x1177   :  { %1172 = vrot.lane.b32.xlu0 %v1170_v58, %s1595_s18 }
0x11e1   :  { %v1256_v60 = vpop.permute.xlu0 %1255 }
0x11e2   :  { %v1258_v44 = vmul.f32 %v1256_v60, %v1239_v36 }
0x11e4   :  { %1260 = vrot.lane.b32.xlu2 %v1258_v44, %s1595_s18 }
0x11e9   :  { %v1173_v51 = vpop.permute.xlu0 %1172 }
0x11ea   :  { %1323 = vst.msk [vmem:[%s2101_s12] sm:$0xff] %vm69_vm0, %v1173_v51  ;;  %1437 = vmatmul.msk.f32.vlgmr.msrb.gmra.mxu1 %vm69_vm0, %v1173_v51 }
0x123e   :  { %v1261_v61 = vpop.permute.xlu2 %1260 }
0x123f   :  { %1440 = vmatmul.msk.f32.vlgmr.msrb.gmra.mxu3 %vm69_vm0, %v1261_v61 }
0x1267   :  { %v1193_v62 = vpop.f32.mrf.mxu1 }
0x1268   :  { %v1194_v2 = vadd.f32 %v2043_v5, %v1193_v62 }
0x12c2   :  { %v1281_v3 = vpop.f32.mrf.mxu3 }
0x12c3   :  { %v1284_v7 = vadd.f32 %v1281_v3, %v1194_v2 }
0x12c5   :  { %1576 = vtanh.f32 %v1284_v7  ;;  %v1441_v9 = vmul.f32 -1.442695, %v1284_v7 }
0x12c7   :  { %1578 = vpow2.f32 %v1441_v9 }
0x12cb   :  { %v1577_v56 = vpop.eup %1576 }
0x12cc   :  { %1307 = vrot.lane.b32.xlu1 %v1577_v56, %s1596_s26 }
0x12cd   :  { %v1579_v10 = vpop.eup %1578 }
0x12ce   :  { %v1288_v13 = vadd.f32 1.0, %v1579_v10 }
0x12d0   :  { %1580 = vrcp.f32 %v1288_v13  ;;  %v1300_v16 = vand.u32 2147483648, %v1288_v13  ;;  %vm1294_vm2 = vweird.f32 %v1288_v13  ;;  %v1298_v17 = vand.u32 2147483647, %v1288_v13 }
0x12d2   :  { %v1301_v39 = vor.u32 1.1754944e-38, %v1300_v16  ;;  %vm1299_vm4 = vcmp.eq.f32.partialorder %v1298_v17, 8.507059e+37 }
0x12d4   :  { %1344 = vrot.lane.b32.xlu1 %v1454_v45, %s1597_s20 }
0x12d6   :  { %v1581_v12 = vpop.eup %1580 }
0x12d7   :  { %v1290_v63 = vmul.f32 %v1581_v12, %v1288_v13  ;;  %vm1295_vm1 = vweird.f32 %v1581_v12 }
0x12d8   :  { %vm1296_vm3 = vmor %vm1294_vm2, %vm1295_vm1 }
0x12d9   :  { %v1291_v59 = vsub.f32 1.0, %v1290_v63 }
0x12db   :  { %v1292_v14 = vmul.f32 %v1581_v12, %v1291_v59 }
0x12dc   :  { %1325 = vrot.lane.b32.xlu1 %v1164_v50, %s1597_s20 }
0x12dd   :  { %v1293_v15 = vadd.f32 %v1581_v12, %v1292_v14 }
0x12df   :  { %v1297_v0 = vsel %vm1296_vm3, %v1581_v12, %v1293_v15 }
0x12e0   :  { %v1302_v19 = vsel %vm1299_vm4, %v1301_v39, %v1297_v0 }
0x12e1   :  { %v1305_v40 = vmul.f32 %v1302_v19, %v1252_v55 }
0x133e   :  { %v1308_v46 = vpop.permute.xlu1 %1307 }
0x133f   :  { %v1310_v5 = vmul.f32 %v1308_v46, %v1302_v19 }
0x1341   :  { %1312 = vrot.lane.b32.xlu2 %v1310_v5, %s1595_s18 }
0x1346   :  { %v1345_v18 = vpop.permute.xlu1 %1344 }
0x134e   :  { %v1326_v1 = vpop.permute.xlu1 %1325 }
0x134f   :  { %1328 = vst.msk [vmem:[%s2103_s13] sm:$0xff] %vm69_vm0, %v1326_v1 }
0x139b   :  { %v1313_v4 = vpop.permute.xlu2 %1312 }
0x139c   :  { %v1315_v42 = vadd.f32 %v1313_v4, %v1305_v40 }
0x139e   :  { %1582 = vtanh.f32 %v1315_v42  ;;  %1336 = vrot.lane.b32.xlu1 %v1315_v42, %s1597_s20 }
0x13a4   :  { %v1583_v6 = vpop.eup %1582 }
0x13a5   :  { %1318 = vrot.lane.b32.xlu0 %v1583_v6, %s1596_s26 }
0x1410   :  { %v1337_v20 = vpop.permute.xlu1 %1336 }
0x1411   :  { %1443 = vst.msk [vmem:[%s2103_s13 + $0x8] sm:$0xff] %vm69_vm0, %v1337_v20 }
0x1417   :  { %v1319_v21 = vpop.permute.xlu0 %1318 }
0x1418   :  { %v1321_v22 = vmul.f32 %v1319_v21, %v1302_v19 }
0x141a   :  { %v1347_v37 = vmul.f32 %v1345_v18, %v1321_v22 }
0x141c   :  { %1349 = vrot.lane.b32.xlu2 %v1347_v37, %s1595_s18 }
0x1424   :  { %1330 = vrot.lane.b32.xlu2 %v1321_v22, %s1595_s18 }
0x1476   :  { %v1350_v8 = vpop.permute.xlu2 %1349 }
0x1477   :  { %v1352_v11 = vsel %vm69_vm0, %v1350_v8, 0.0 }
0x1478   :  { %1353 = vadd.xlane.f32.xlu0 %v1352_v11 }
0x147e   :  { %v1331_v41 = vpop.permute.xlu2 %1330 }
0x147f   :  { %1442 = vst.msk [vmem:[%s2101_s12 + $0x8] sm:$0xff] %vm69_vm0, %v1331_v41 }
0x14eb   :  { %v1354_v43 = vpop.xlane.xlu0 %1353 }
0x14ec   :  { %v1359_v24 = vadd.f32 %v1455_v23, %v1354_v43 }
0x14ee   :  { %v1444_v25 = vmul.f32 -1.442695, %v1359_v24 }
0x14f0   :  { %1584 = vpow2.f32 %v1444_v25 }
0x14f6   :  { %v1585_v26 = vpop.eup %1584 }
0x14f7   :  { %v1363_v27 = vadd.f32 1.0, %v1585_v26 }
0x14f9   :  { %1586 = vrcp.f32 %v1363_v27  ;;  %v1375_v31 = vand.u32 2147483648, %v1363_v27  ;;  %v1373_v33 = vand.u32 2147483647, %v1363_v27  ;;  %vm1369_vm6 = vweird.f32 %v1363_v27 }
0x14fb   :  { %v1376_v36 = vor.u32 1.1754944e-38, %v1375_v31  ;;  %vm1374_vm0 = vcmp.eq.f32.partialorder %v1373_v33, 8.507059e+37 }
0x14ff   :  { %v1587_v28 = vpop.eup %1586 }
0x1500   :  { %v1365_v29 = vmul.f32 %v1587_v28, %v1363_v27  ;;  %vm1370_vm5 = vweird.f32 %v1587_v28 }
0x1501   :  { %vm1371_vm8 = vmor %vm1369_vm6, %vm1370_vm5 }
0x1502   :  { %v1366_v30 = vsub.f32 1.0, %v1365_v29 }
0x1504   :  { %v1367_v32 = vmul.f32 %v1587_v28, %v1366_v30 }
0x1506   :  { %v1368_v34 = vadd.f32 %v1587_v28, %v1367_v32 }
0x1508   :  { %v1372_v47 = vsel %vm1371_vm8, %v1587_v28, %v1368_v34 }
0x1509   :  { %v1377_v49 = vsel %vm1374_vm0, %v1376_v36, %v1372_v47 }
0x150a   :  { %1380 = vst.msk [vmem:[%s2105_s11] sm:$0xff] %vm1379_vm7, %v1377_v49 }

</bundles_post_ra>
